<compile_context>
chip_gen: v6e
topology: v6e:2x2x1
jax: 0.10.0
libtpu: 0.0.40
codegen_flags: <defaults>
</compile_context>

<pallas_src>
import jax
import jax.numpy as jnp
from jax.experimental import pallas as pl
from jax.experimental.pallas import tpu as pltpu


def _layer_norm(v, g, b, eps=1e-5):
    mu = jnp.mean(v, axis=-1, keepdims=True)
    d = v - mu
    var = jnp.mean(d * d, axis=-1, keepdims=True)
    return d * jax.lax.rsqrt(var + eps) * g + b


def _tab_transformer_kernel(
    x_ref, emb_w_ref, emb_b_ref, cls_ref, pos_ref, hs_ref, ht_ref,
    wqkv_ref, bqkv_ref, wo_ref, bo_ref, w1_ref, b1_ref, w2_ref, b2_ref,
    g1_ref, be1_ref, g2_ref, be2_ref,
    out_ref, t_ref,
):
    TB = x_ref.shape[0]                 # batch tile
    H = emb_w_ref.shape[1]              # hidden dim
    Hp = wqkv_ref.shape[1] // 3         # lane-aligned q/k/v section stride
    l = pl.program_id(1)                # layer index (innermost grid axis)

    def mm(a, w_ref, b_ref):
        # bf16 operands (weights pre-cast host-side), f32 MXU accumulation.
        return jnp.dot(a.astype(jnp.bfloat16), w_ref[...],
                       preferred_element_type=jnp.float32) + b_ref[...]

    def swap(a):
        # Swap the two TB-row token halves of a stacked (2*TB, H) slab.
        if TB % 8 == 0 and H % 128 == 0:
            # vreg-aligned: sublane rotation on the otherwise-idle XLU,
            # avoiding the extra VMEM copy a concatenate would materialize.
            return pltpu.roll(a, shift=TB, axis=0)
        return jnp.concatenate([a[TB:], a[:TB]], axis=0)

    # First layer step of each batch tile: build the 2-token sequence
    #   token 0 = cls + pos[0]  (batch-invariant),  token 1 = emb(x) + pos[1]
    # stacked as a (2*TB, H) slab so every matmul runs once at double fill.
    @pl.when(l == 0)
    def _():
        t_ref[:TB, :] = jnp.broadcast_to(cls_ref[...] + pos_ref[0:1, :], (TB, H))
        t_ref[TB:, :] = mm(x_ref[...], emb_w_ref, emb_b_ref) + pos_ref[1:2, :]

    t = t_ref[...]

    # ---- self-attention: seq len 2, per-head softmax over {same, other} ----
    qkv = mm(t, wqkv_ref, bqkv_ref)                          # (2TB, 3*Hp)
    q = qkv[:, 0:H]
    k = qkv[:, Hp:Hp + H]
    v = qkv[:, 2 * Hp:2 * Hp + H]
    k_sw = swap(k)
    v_sw = swap(v)

    # Per-head (cross - same) score; 1/sqrt(head_dim) is folded into hs_ref.
    d = jnp.dot((q * (k_sw - k)).astype(jnp.bfloat16), hs_ref[...],
                preferred_element_type=jnp.float32)          # (2TB, NH)
    # p_same = sigmoid(-d), stable form (exp argument always <= 0).
    e = jnp.exp(-jnp.abs(d))
    p = jnp.where(d >= 0.0, e, 1.0) * pl.reciprocal(1.0 + e, approx=True)
    # Expand per-head prob back to per-feature lanes; p_cross == 1 - p_same
    # exactly because the columns of ht_ref are one-hot.
    a = jnp.dot(p.astype(jnp.bfloat16), ht_ref[...],
                preferred_element_type=jnp.float32)          # (2TB, H)
    attn = v_sw + a * (v - v_sw)

    # residual + norm1 (dropout is identity in eval mode)
    t = _layer_norm(t + mm(attn, wo_ref, bo_ref), g1_ref[...], be1_ref[...])

    # feed-forward (relu) + residual + norm2
    h = jnp.maximum(mm(t, w1_ref, b1_ref), 0.0)
    t = _layer_norm(t + mm(h, w2_ref, b2_ref), g2_ref[...], be2_ref[...])
    t_ref[...] = t

    @pl.when(l == pl.num_programs(1) - 1)
    def _():
        # Lane-dense cls-token slab, stored bf16; the 1-wide fc runs in the
        # wrapper, so the kernel never performs a masked 1-lane store.
        out_ref[...] = t[:TB, :].astype(out_ref.dtype)


def _const_map(ndim):
    return lambda i, l: (0,) * ndim


def _layer_map(ndim):
    return lambda i, l: (l,) + (0,) * (ndim - 1)


def _pick_tb(B):
    # Prefer >= 2 batch-grid steps (so the "parallel" axis can shard across
    # v7x's two TensorCores) and sublane-aligned (multiple-of-8) tiles.
    for tb in (512, 256, 128, 64, 32, 16, 8):
        if B % tb == 0 and B // tb >= 2:
            return tb
    return B


def tab_transformer_forward(x, kp, *, tb=None):
    B, F = x.shape
    H = kp["emb_w"].shape[1]
    L = kp["wqkv"].shape[0]
    if tb is None:
        tb = _pick_tb(B)
    assert B % tb == 0

    consts = (kp["emb_w"], kp["emb_b"], kp["cls"], kp["pos"],
              kp["hmask_s"], kp["hmask_t"])
    layered = (kp["wqkv"], kp["bqkv"], kp["wo"], kp["bo"],
               kp["w1"], kp["b1"], kp["w2"], kp["b2"],
               kp["g1"], kp["be1"], kp["g2"], kp["be2"])

    in_specs = [pl.BlockSpec((tb, F), lambda i, l: (i, 0))]
    # Small batch-invariant constants: full blocks, VMEM-resident across grid.
    in_specs += [pl.BlockSpec(a.shape, _const_map(a.ndim)) for a in consts]
    # Per-layer weight stacks: stream one layer per inner grid step (leading
    # dim squeezed); the auto-pipeline prefetches layer l+1 behind layer l.
    in_specs += [pl.BlockSpec((None,) + a.shape[1:], _layer_map(a.ndim))
                 for a in layered]

    cls_out = pl.pallas_call(
        _tab_transformer_kernel,
        out_shape=jax.ShapeDtypeStruct((B, H), jnp.bfloat16),
        grid=(B // tb, L),
        in_specs=in_specs,
        out_specs=pl.BlockSpec((tb, H), lambda i, l: (i, 0)),
        scratch_shapes=[pltpu.VMEM((2 * tb, H), jnp.float32)],
        compiler_params=pltpu.CompilerParams(
            dimension_semantics=("parallel", "arbitrary"),
            # Below v7x's 64 MiB/TC physical ceiling; leaves headroom for
            # Mosaic internal scratch on every generation.
            vmem_limit_bytes=48 * 1024 * 1024),
    )(x, *consts, *layered)

    # Final 1-wide linear + squeeze(1), done lane-dense outside the kernel.
    return (cls_out.astype(jnp.float32) @ kp["fc_w"] + kp["fc_b"])[:, 0]


def pack_kernel_params(params):
    """One-time host-side packing:
      * fuse wq/wk/wv (+ biases) into a single (H, 3*Hp) QKV weight, with the
        per-section stride Hp rounded up to 128 lanes so in-kernel q/k/v
        slices start at lane-tile-aligned offsets,
      * cast the big matmul weights and the one-hot head masks to bf16,
      * fold the 1/sqrt(head_dim) attention scale into the score mask.
    """
    L, H, _ = params["wq"].shape
    NH = params["hmask"].shape[1]
    HD = H // NH
    Hp = ((H + 127) // 128) * 128

    wqkv = jnp.zeros((L, H, 3 * Hp), jnp.float32)
    wqkv = wqkv.at[:, :, 0:H].set(params["wq"])
    wqkv = wqkv.at[:, :, Hp:Hp + H].set(params["wk"])
    wqkv = wqkv.at[:, :, 2 * Hp:2 * Hp + H].set(params["wv"])
    bqkv = jnp.zeros((L, 1, 3 * Hp), jnp.float32)
    bqkv = bqkv.at[:, :, 0:H].set(params["bq"])
    bqkv = bqkv.at[:, :, Hp:Hp + H].set(params["bk"])
    bqkv = bqkv.at[:, :, 2 * Hp:2 * Hp + H].set(params["bv"])

    return dict(
        emb_w=params["emb_w"].astype(jnp.bfloat16),
        emb_b=params["emb_b"],
        cls=params["cls"], pos=params["pos"],
        hmask_s=(params["hmask"] / (HD ** 0.5)).astype(jnp.bfloat16),
        hmask_t=params["hmask"].T.astype(jnp.bfloat16),
        wqkv=wqkv.astype(jnp.bfloat16), bqkv=bqkv,
        wo=params["wo"].astype(jnp.bfloat16), bo=params["bo"],
        w1=params["w1"].astype(jnp.bfloat16), b1=params["b1"],
        w2=params["w2"].astype(jnp.bfloat16), b2=params["b2"],
        g1=params["g1"], be1=params["be1"],
        g2=params["g2"], be2=params["be2"],
        fc_w=params["fc_w"], fc_b=params["fc_b"],
    )


def reference_forward(x, params):
    """Pure-JAX reference mirroring PyTorch TransformerEncoder (eval) math."""
    B = x.shape[0]
    H = params["emb_w"].shape[1]
    NH = params["hmask"].shape[1]
    HD = H // NH
    L = params["wq"].shape[0]
    emb = x @ params["emb_w"] + params["emb_b"]
    t = jnp.concatenate(
        [jnp.broadcast_to(params["cls"][None], (B, 1, H)), emb[:, None, :]], axis=1)
    t = t + params["pos"][None, :, :]
    for l in range(L):
        q = t @ params["wq"][l] + params["bq"][l]
        k = t @ params["wk"][l] + params["bk"][l]
        v = t @ params["wv"][l] + params["bv"][l]
        qh = q.reshape(B, 2, NH, HD).transpose(0, 2, 1, 3)
        kh = k.reshape(B, 2, NH, HD).transpose(0, 2, 1, 3)
        vh = v.reshape(B, 2, NH, HD).transpose(0, 2, 1, 3)
        s = jnp.einsum("bhqd,bhkd->bhqk", qh, kh) / (HD ** 0.5)
        p = jax.nn.softmax(s, axis=-1)
        o = jnp.einsum("bhqk,bhkd->bhqd", p, vh).transpose(0, 2, 1, 3).reshape(B, 2, H)
        o = o @ params["wo"][l] + params["bo"][l]
        t = _layer_norm(t + o, params["g1"][l], params["be1"][l])
        f = (jnp.maximum(t @ params["w1"][l] + params["b1"][l], 0.0)
             @ params["w2"][l] + params["b2"][l])
        t = _layer_norm(t + f, params["g2"][l], params["be2"][l])
    return (t[:, 0, :] @ params["fc_w"] + params["fc_b"])[:, 0]


def init_params(key, F, H, L, NH):
    # Deterministic synthetic weights (no checkpoint load).  Every linear
    # weight is pre-transposed to (in_dim, out_dim) so kernels compute x@W+b.
    ks = list(jax.random.split(key, 32))
    it = iter(ks)

    def nrm(shape, scale=0.1):
        return (scale * jax.random.normal(next(it), shape)).astype(jnp.float32)

    HD = H // NH
    hmask = (jnp.arange(H)[:, None] // HD == jnp.arange(NH)[None, :]).astype(jnp.float32)
    # NOTE: pos_embedding in the module is (1, F+1, H) but the forward only
    # ever uses positions [0:2] (seq len is 2), so only that slice is built.
    return dict(
        emb_w=nrm((F, H)), emb_b=nrm((1, H)),
        cls=nrm((1, H), 1.0), pos=nrm((2, H), 1.0),
        hmask=hmask,
        wq=nrm((L, H, H)), wk=nrm((L, H, H)), wv=nrm((L, H, H)),
        bq=nrm((L, 1, H)), bk=nrm((L, 1, H)), bv=nrm((L, 1, H)),
        wo=nrm((L, H, H)), bo=nrm((L, 1, H)),
        w1=nrm((L, H, 4 * H)), b1=nrm((L, 1, 4 * H)),
        w2=nrm((L, 4 * H, H)), b2=nrm((L, 1, H)),
        g1=1.0 + nrm((L, 1, H)), be1=nrm((L, 1, H)),
        g2=1.0 + nrm((L, 1, H)), be2=nrm((L, 1, H)),
        fc_w=nrm((H, 1)), fc_b=nrm((1, 1)),
    )


if __name__ == "__main__":
    B, F, H, L, NH = 8, 16, 32, 2, 4   # batch, in_features, hidden, layers, heads
    key = jax.random.PRNGKey(0)
    pkey, xkey = jax.random.split(key)
    params = init_params(pkey, F, H, L, NH)
    kp = pack_kernel_params(params)     # one-time host-side packing (bf16, fused QKV)
    x = jax.random.normal(xkey, (B, F), dtype=jnp.float32)

    out = tab_transformer_forward(x, kp)
    out = jax.block_until_ready(out)

    ref = reference_forward(x, params)
    assert out.shape == (B,)
    # tolerance accounts for bf16 MXU operands + bf16 output slab in the kernel
    assert jnp.allclose(out, ref, rtol=2e-2, atol=4e-2), (out, ref)
    print("KERNEL_OK")
</pallas_src>

<mosaic_0001>
module attributes {stable_mosaic.version = 11 : i64} {
  func.func @_tab_transformer_kernel(%arg0: i32, %arg1: i32, %arg2: memref<8x16xf32, #tpu.memory_space<vmem>>, %arg3: memref<16x32xbf16, #tpu.memory_space<vmem>>, %arg4: memref<1x32xf32, #tpu.memory_space<vmem>>, %arg5: memref<1x32xf32, #tpu.memory_space<vmem>>, %arg6: memref<2x32xf32, #tpu.memory_space<vmem>>, %arg7: memref<32x4xbf16, #tpu.memory_space<vmem>>, %arg8: memref<4x32xbf16, #tpu.memory_space<vmem>>, %arg9: memref<1x32x384xbf16, #tpu.memory_space<vmem>>, %arg10: memref<1x1x384xf32, #tpu.memory_space<vmem>>, %arg11: memref<1x32x32xbf16, #tpu.memory_space<vmem>>, %arg12: memref<1x1x32xf32, #tpu.memory_space<vmem>>, %arg13: memref<1x32x128xbf16, #tpu.memory_space<vmem>>, %arg14: memref<1x1x128xf32, #tpu.memory_space<vmem>>, %arg15: memref<1x128x32xbf16, #tpu.memory_space<vmem>>, %arg16: memref<1x1x32xf32, #tpu.memory_space<vmem>>, %arg17: memref<1x1x32xf32, #tpu.memory_space<vmem>>, %arg18: memref<1x1x32xf32, #tpu.memory_space<vmem>>, %arg19: memref<1x1x32xf32, #tpu.memory_space<vmem>>, %arg20: memref<1x1x32xf32, #tpu.memory_space<vmem>>, %arg21: memref<8x32xbf16, #tpu.memory_space<vmem>>, %arg22: memref<16x32xf32, #tpu.memory_space<vmem>>) attributes {dimension_semantics = [#tpu.dimension_semantics<parallel>, #tpu.dimension_semantics<arbitrary>], iteration_bounds = array<i64: 1, 2>, scalar_prefetch = 0 : i64, scratch_operands = 1 : i64, tpu.core_type = #tpu.core_type<tc>, window_params = [{transform_indices = @transform_0, window_bounds = array<i64: 8, 16>}, {pipeline_mode = #tpu.pipeline_mode<synchronous>, transform_indices = @transform_1, window_bounds = array<i64: 16, 32>}, {pipeline_mode = #tpu.pipeline_mode<synchronous>, transform_indices = @transform_2, window_bounds = array<i64: 1, 32>}, {pipeline_mode = #tpu.pipeline_mode<synchronous>, transform_indices = @transform_3, window_bounds = array<i64: 1, 32>}, {pipeline_mode = #tpu.pipeline_mode<synchronous>, transform_indices = @transform_4, window_bounds = array<i64: 2, 32>}, {pipeline_mode = #tpu.pipeline_mode<synchronous>, transform_indices = @transform_5, window_bounds = array<i64: 32, 4>}, {pipeline_mode = #tpu.pipeline_mode<synchronous>, transform_indices = @transform_6, window_bounds = array<i64: 4, 32>}, {transform_indices = @transform_7, window_bounds = array<i64: 1, 32, 384>}, {transform_indices = @transform_8, window_bounds = array<i64: 1, 1, 384>}, {transform_indices = @transform_9, window_bounds = array<i64: 1, 32, 32>}, {transform_indices = @transform_10, window_bounds = array<i64: 1, 1, 32>}, {transform_indices = @transform_11, window_bounds = array<i64: 1, 32, 128>}, {transform_indices = @transform_12, window_bounds = array<i64: 1, 1, 128>}, {transform_indices = @transform_13, window_bounds = array<i64: 1, 128, 32>}, {transform_indices = @transform_14, window_bounds = array<i64: 1, 1, 32>}, {transform_indices = @transform_15, window_bounds = array<i64: 1, 1, 32>}, {transform_indices = @transform_16, window_bounds = array<i64: 1, 1, 32>}, {transform_indices = @transform_17, window_bounds = array<i64: 1, 1, 32>}, {transform_indices = @transform_18, window_bounds = array<i64: 1, 1, 32>}, {transform_indices = @transform_19, window_bounds = array<i64: 8, 32>}]} {
    %c0_i32 = arith.constant 0 : i32
    %0 = arith.cmpi eq, %arg1, %c0_i32 : i32
    %1 = arith.extui %0 : i1 to i32
    %c0_i32_0 = arith.constant 0 : i32
    %2 = arith.cmpi ne, %1, %c0_i32_0 : i32
    scf.if %2 {
      %c0_65 = arith.constant 0 : index
      %c0_66 = arith.constant 0 : index
      %124 = vector.load %arg5[%c0_65, %c0_66] : memref<1x32xf32, #tpu.memory_space<vmem>>, vector<1x32xf32>
      %c0_67 = arith.constant 0 : index
      %c0_68 = arith.constant 0 : index
      %125 = vector.load %arg6[%c0_67, %c0_68] : memref<2x32xf32, #tpu.memory_space<vmem>>, vector<1x32xf32>
      %126 = arith.addf %124, %125 : vector<1x32xf32>
      %127 = vector.shape_cast %126 : vector<1x32xf32> to vector<1x32xf32>
      %128 = vector.broadcast %127 : vector<1x32xf32> to vector<8x32xf32>
      %c0_69 = arith.constant 0 : index
      %c0_70 = arith.constant 0 : index
      %129 = vector.load %arg22[%c0_69, %c0_70] : memref<16x32xf32, #tpu.memory_space<vmem>>, vector<8x32xf32>
      tpu.vector_store %arg22[%c0_69, %c0_70], %128 {strides = array<i32>} : memref<16x32xf32, #tpu.memory_space<vmem>>, vector<8x32xf32>,
      %c0_71 = arith.constant 0 : index
      %c0_72 = arith.constant 0 : index
      %130 = vector.load %arg2[%c0_71, %c0_72] : memref<8x16xf32, #tpu.memory_space<vmem>>, vector<8x16xf32>
      %131 = arith.truncf %130 : vector<8x16xf32> to vector<8x16xbf16>
      %c0_73 = arith.constant 0 : index
      %c0_74 = arith.constant 0 : index
      %132 = vector.load %arg3[%c0_73, %c0_74] : memref<16x32xbf16, #tpu.memory_space<vmem>>, vector<16x32xbf16>
      %cst_75 = arith.constant dense<0.000000e+00> : vector<8x32xf32>
      %133 = tpu.matmul %131, %132, %cst_75 {dimension_numbers = #tpu.dot_dimension_numbers<[1], [0], [0], [1], [0, 0, 1, 1], [], []>} : vector<8x16xbf16>, vector<16x32xbf16>, vector<8x32xf32> -> vector<8x32xf32>
      %c0_76 = arith.constant 0 : index
      %c0_77 = arith.constant 0 : index
      %134 = vector.load %arg4[%c0_76, %c0_77] : memref<1x32xf32, #tpu.memory_space<vmem>>, vector<1x32xf32>
      %135 = vector.broadcast %134 : vector<1x32xf32> to vector<8x32xf32>
      %136 = arith.addf %133, %135 : vector<8x32xf32>
      %c1 = arith.constant 1 : index
      %c0_78 = arith.constant 0 : index
      %137 = vector.load %arg6[%c1, %c0_78] : memref<2x32xf32, #tpu.memory_space<vmem>>, vector<1x32xf32>
      %138 = vector.broadcast %137 : vector<1x32xf32> to vector<8x32xf32>
      %139 = arith.addf %136, %138 : vector<8x32xf32>
      %c8 = arith.constant 8 : index
      %c0_79 = arith.constant 0 : index
      %140 = vector.load %arg22[%c8, %c0_79] : memref<16x32xf32, #tpu.memory_space<vmem>>, vector<8x32xf32>
      tpu.vector_store %arg22[%c8, %c0_79], %139 {strides = array<i32>} : memref<16x32xf32, #tpu.memory_space<vmem>>, vector<8x32xf32>,
    } else {
    }
    %c0 = arith.constant 0 : index
    %c0_1 = arith.constant 0 : index
    %3 = vector.load %arg22[%c0, %c0_1] : memref<16x32xf32, #tpu.memory_space<vmem>>, vector<16x32xf32>
    %4 = arith.truncf %3 : vector<16x32xf32> to vector<16x32xbf16>
    %c0_2 = arith.constant 0 : index
    %c0_3 = arith.constant 0 : index
    %c0_4 = arith.constant 0 : index
    %5 = vector.load %arg9[%c0_2, %c0_3, %c0_4] : memref<1x32x384xbf16, #tpu.memory_space<vmem>>, vector<1x32x384xbf16>
    %6 = vector.shape_cast %5 : vector<1x32x384xbf16> to vector<32x384xbf16>
    %cst = arith.constant dense<0.000000e+00> : vector<16x384xf32>
    %7 = tpu.matmul %4, %6, %cst {dimension_numbers = #tpu.dot_dimension_numbers<[1], [0], [0], [1], [0, 0, 1, 1], [], []>} : vector<16x32xbf16>, vector<32x384xbf16>, vector<16x384xf32> -> vector<16x384xf32>
    %c0_5 = arith.constant 0 : index
    %c0_6 = arith.constant 0 : index
    %c0_7 = arith.constant 0 : index
    %8 = vector.load %arg10[%c0_5, %c0_6, %c0_7] : memref<1x1x384xf32, #tpu.memory_space<vmem>>, vector<1x1x384xf32>
    %9 = vector.shape_cast %8 : vector<1x1x384xf32> to vector<1x384xf32>
    %10 = vector.broadcast %9 : vector<1x384xf32> to vector<16x384xf32>
    %11 = arith.addf %7, %10 : vector<16x384xf32>
    %12 = vector.extract_strided_slice %11 {offsets = [0, 0], sizes = [16, 32], strides = [1, 1]} : vector<16x384xf32> to vector<16x32xf32>
    %13 = vector.extract_strided_slice %11 {offsets = [0, 128], sizes = [16, 32], strides = [1, 1]} : vector<16x384xf32> to vector<16x32xf32>
    %14 = vector.extract_strided_slice %11 {offsets = [0, 256], sizes = [16, 32], strides = [1, 1]} : vector<16x384xf32> to vector<16x32xf32>
    %15 = vector.extract_strided_slice %13 {offsets = [8, 0], sizes = [8, 32], strides = [1, 1]} : vector<16x32xf32> to vector<8x32xf32>
    %16 = vector.extract_strided_slice %13 {offsets = [0, 0], sizes = [8, 32], strides = [1, 1]} : vector<16x32xf32> to vector<8x32xf32>
    %17 = tpu.concatenate %15, %16 in 0 : vector<8x32xf32>, vector<8x32xf32> -> vector<16x32xf32>
    %18 = vector.extract_strided_slice %14 {offsets = [8, 0], sizes = [8, 32], strides = [1, 1]} : vector<16x32xf32> to vector<8x32xf32>
    %19 = vector.extract_strided_slice %14 {offsets = [0, 0], sizes = [8, 32], strides = [1, 1]} : vector<16x32xf32> to vector<8x32xf32>
    %20 = tpu.concatenate %18, %19 in 0 : vector<8x32xf32>, vector<8x32xf32> -> vector<16x32xf32>
    %21 = arith.subf %17, %13 : vector<16x32xf32>
    %22 = arith.mulf %12, %21 : vector<16x32xf32>
    %23 = arith.truncf %22 : vector<16x32xf32> to vector<16x32xbf16>
    %c0_8 = arith.constant 0 : index
    %c0_9 = arith.constant 0 : index
    %24 = vector.load %arg7[%c0_8, %c0_9] : memref<32x4xbf16, #tpu.memory_space<vmem>>, vector<32x4xbf16>
    %cst_10 = arith.constant dense<0.000000e+00> : vector<16x4xf32>
    %25 = tpu.matmul %23, %24, %cst_10 {dimension_numbers = #tpu.dot_dimension_numbers<[1], [0], [0], [1], [0, 0, 1, 1], [], []>} : vector<16x32xbf16>, vector<32x4xbf16>, vector<16x4xf32> -> vector<16x4xf32>
    %26 = math.absf %25 : vector<16x4xf32>
    %cst_11 = arith.constant 0.000000e+00 : f32
    %27 = vector.broadcast %cst_11 : f32 to vector<16x4xf32>
    %28 = arith.subf %27, %26 : vector<16x4xf32>
    %29 = math.exp %28 : vector<16x4xf32>
    %cst_12 = arith.constant 0.000000e+00 : f32
    %30 = vector.broadcast %cst_12 : f32 to vector<16x4xf32>
    %31 = arith.cmpf oge, %25, %30 : vector<16x4xf32>
    %cst_13 = arith.constant 1.000000e+00 : f32
    %32 = vector.broadcast %cst_13 : f32 to vector<16x4xf32>
    %33 = arith.select %31, %29, %32 : vector<16x4xi1>, vector<16x4xf32>
    %cst_14 = arith.constant 1.000000e+00 : f32
    %34 = vector.broadcast %cst_14 : f32 to vector<16x4xf32>
    %35 = arith.addf %34, %29 : vector<16x4xf32>
    %36 = tpu.reciprocal %35 {approx = true} : vector<16x4xf32> -> vector<16x4xf32>
    %37 = arith.mulf %33, %36 : vector<16x4xf32>
    %38 = arith.truncf %37 : vector<16x4xf32> to vector<16x4xbf16>
    %c0_15 = arith.constant 0 : index
    %c0_16 = arith.constant 0 : index
    %39 = vector.load %arg8[%c0_15, %c0_16] : memref<4x32xbf16, #tpu.memory_space<vmem>>, vector<4x32xbf16>
    %cst_17 = arith.constant dense<0.000000e+00> : vector<16x32xf32>
    %40 = tpu.matmul %38, %39, %cst_17 {dimension_numbers = #tpu.dot_dimension_numbers<[1], [0], [0], [1], [0, 0, 1, 1], [], []>} : vector<16x4xbf16>, vector<4x32xbf16>, vector<16x32xf32> -> vector<16x32xf32>
    %41 = arith.subf %14, %20 : vector<16x32xf32>
    %42 = arith.mulf %40, %41 : vector<16x32xf32>
    %43 = arith.addf %20, %42 : vector<16x32xf32>
    %44 = arith.truncf %43 : vector<16x32xf32> to vector<16x32xbf16>
    %c0_18 = arith.constant 0 : index
    %c0_19 = arith.constant 0 : index
    %c0_20 = arith.constant 0 : index
    %45 = vector.load %arg11[%c0_18, %c0_19, %c0_20] : memref<1x32x32xbf16, #tpu.memory_space<vmem>>, vector<1x32x32xbf16>
    %46 = vector.shape_cast %45 : vector<1x32x32xbf16> to vector<32x32xbf16>
    %cst_21 = arith.constant dense<0.000000e+00> : vector<16x32xf32>
    %47 = tpu.matmul %44, %46, %cst_21 {dimension_numbers = #tpu.dot_dimension_numbers<[1], [0], [0], [1], [0, 0, 1, 1], [], []>} : vector<16x32xbf16>, vector<32x32xbf16>, vector<16x32xf32> -> vector<16x32xf32>
    %c0_22 = arith.constant 0 : index
    %c0_23 = arith.constant 0 : index
    %c0_24 = arith.constant 0 : index
    %48 = vector.load %arg12[%c0_22, %c0_23, %c0_24] : memref<1x1x32xf32, #tpu.memory_space<vmem>>, vector<1x1x32xf32>
    %49 = vector.shape_cast %48 : vector<1x1x32xf32> to vector<1x32xf32>
    %50 = vector.broadcast %49 : vector<1x32xf32> to vector<16x32xf32>
    %51 = arith.addf %47, %50 : vector<16x32xf32>
    %52 = arith.addf %3, %51 : vector<16x32xf32>
    %c0_25 = arith.constant 0 : index
    %c0_26 = arith.constant 0 : index
    %c0_27 = arith.constant 0 : index
    %53 = vector.load %arg17[%c0_25, %c0_26, %c0_27] : memref<1x1x32xf32, #tpu.memory_space<vmem>>, vector<1x1x32xf32>
    %54 = vector.shape_cast %53 : vector<1x1x32xf32> to vector<1x32xf32>
    %c0_28 = arith.constant 0 : index
    %c0_29 = arith.constant 0 : index
    %c0_30 = arith.constant 0 : index
    %55 = vector.load %arg18[%c0_28, %c0_29, %c0_30] : memref<1x1x32xf32, #tpu.memory_space<vmem>>, vector<1x1x32xf32>
    %56 = vector.shape_cast %55 : vector<1x1x32xf32> to vector<1x32xf32>
    %cst_31 = arith.constant dense<0.000000e+00> : vector<16xf32>
    %57 = vector.multi_reduction <add>, %52, %cst_31 [1] : vector<16x32xf32> to vector<16xf32>
    %58 = vector.shape_cast %57 : vector<16xf32> to vector<16x1xf32>
    %cst_32 = arith.constant 3.200000e+01 : f32
    %59 = vector.broadcast %cst_32 : f32 to vector<16x1xf32>
    %60 = arith.divf %58, %59 : vector<16x1xf32>
    %61 = vector.broadcast %60 : vector<16x1xf32> to vector<16x32xf32>
    %62 = arith.subf %52, %61 : vector<16x32xf32>
    %63 = arith.mulf %62, %62 : vector<16x32xf32>
    %cst_33 = arith.constant dense<0.000000e+00> : vector<16xf32>
    %64 = vector.multi_reduction <add>, %63, %cst_33 [1] : vector<16x32xf32> to vector<16xf32>
    %65 = vector.shape_cast %64 : vector<16xf32> to vector<16x1xf32>
    %cst_34 = arith.constant 3.200000e+01 : f32
    %66 = vector.broadcast %cst_34 : f32 to vector<16x1xf32>
    %67 = arith.divf %65, %66 : vector<16x1xf32>
    %cst_35 = arith.constant 9.99999974E-6 : f32
    %68 = vector.broadcast %cst_35 : f32 to vector<16x1xf32>
    %69 = arith.addf %67, %68 : vector<16x1xf32>
    %70 = math.rsqrt %69 : vector<16x1xf32>
    %71 = vector.broadcast %70 : vector<16x1xf32> to vector<16x32xf32>
    %72 = arith.mulf %62, %71 : vector<16x32xf32>
    %73 = vector.broadcast %54 : vector<1x32xf32> to vector<16x32xf32>
    %74 = arith.mulf %72, %73 : vector<16x32xf32>
    %75 = vector.broadcast %56 : vector<1x32xf32> to vector<16x32xf32>
    %76 = arith.addf %74, %75 : vector<16x32xf32>
    %77 = arith.truncf %76 : vector<16x32xf32> to vector<16x32xbf16>
    %c0_36 = arith.constant 0 : index
    %c0_37 = arith.constant 0 : index
    %c0_38 = arith.constant 0 : index
    %78 = vector.load %arg13[%c0_36, %c0_37, %c0_38] : memref<1x32x128xbf16, #tpu.memory_space<vmem>>, vector<1x32x128xbf16>
    %79 = vector.shape_cast %78 : vector<1x32x128xbf16> to vector<32x128xbf16>
    %cst_39 = arith.constant dense<0.000000e+00> : vector<16x128xf32>
    %80 = tpu.matmul %77, %79, %cst_39 {dimension_numbers = #tpu.dot_dimension_numbers<[1], [0], [0], [1], [0, 0, 1, 1], [], []>} : vector<16x32xbf16>, vector<32x128xbf16>, vector<16x128xf32> -> vector<16x128xf32>
    %c0_40 = arith.constant 0 : index
    %c0_41 = arith.constant 0 : index
    %c0_42 = arith.constant 0 : index
    %81 = vector.load %arg14[%c0_40, %c0_41, %c0_42] : memref<1x1x128xf32, #tpu.memory_space<vmem>>, vector<1x1x128xf32>
    %82 = vector.shape_cast %81 : vector<1x1x128xf32> to vector<1x128xf32>
    %83 = vector.broadcast %82 : vector<1x128xf32> to vector<16x128xf32>
    %84 = arith.addf %80, %83 : vector<16x128xf32>
    %cst_43 = arith.constant 0.000000e+00 : f32
    %85 = vector.broadcast %cst_43 : f32 to vector<16x128xf32>
    %86 = arith.maximumf %84, %85 : vector<16x128xf32>
    %87 = arith.truncf %86 : vector<16x128xf32> to vector<16x128xbf16>
    %c0_44 = arith.constant 0 : index
    %c0_45 = arith.constant 0 : index
    %c0_46 = arith.constant 0 : index
    %88 = vector.load %arg15[%c0_44, %c0_45, %c0_46] : memref<1x128x32xbf16, #tpu.memory_space<vmem>>, vector<1x128x32xbf16>
    %89 = vector.shape_cast %88 : vector<1x128x32xbf16> to vector<128x32xbf16>
    %cst_47 = arith.constant dense<0.000000e+00> : vector<16x32xf32>
    %90 = tpu.matmul %87, %89, %cst_47 {dimension_numbers = #tpu.dot_dimension_numbers<[1], [0], [0], [1], [0, 0, 1, 1], [], []>} : vector<16x128xbf16>, vector<128x32xbf16>, vector<16x32xf32> -> vector<16x32xf32>
    %c0_48 = arith.constant 0 : index
    %c0_49 = arith.constant 0 : index
    %c0_50 = arith.constant 0 : index
    %91 = vector.load %arg16[%c0_48, %c0_49, %c0_50] : memref<1x1x32xf32, #tpu.memory_space<vmem>>, vector<1x1x32xf32>
    %92 = vector.shape_cast %91 : vector<1x1x32xf32> to vector<1x32xf32>
    %93 = vector.broadcast %92 : vector<1x32xf32> to vector<16x32xf32>
    %94 = arith.addf %90, %93 : vector<16x32xf32>
    %95 = arith.addf %76, %94 : vector<16x32xf32>
    %c0_51 = arith.constant 0 : index
    %c0_52 = arith.constant 0 : index
    %c0_53 = arith.constant 0 : index
    %96 = vector.load %arg19[%c0_51, %c0_52, %c0_53] : memref<1x1x32xf32, #tpu.memory_space<vmem>>, vector<1x1x32xf32>
    %97 = vector.shape_cast %96 : vector<1x1x32xf32> to vector<1x32xf32>
    %c0_54 = arith.constant 0 : index
    %c0_55 = arith.constant 0 : index
    %c0_56 = arith.constant 0 : index
    %98 = vector.load %arg20[%c0_54, %c0_55, %c0_56] : memref<1x1x32xf32, #tpu.memory_space<vmem>>, vector<1x1x32xf32>
    %99 = vector.shape_cast %98 : vector<1x1x32xf32> to vector<1x32xf32>
    %cst_57 = arith.constant dense<0.000000e+00> : vector<16xf32>
    %100 = vector.multi_reduction <add>, %95, %cst_57 [1] : vector<16x32xf32> to vector<16xf32>
    %101 = vector.shape_cast %100 : vector<16xf32> to vector<16x1xf32>
    %cst_58 = arith.constant 3.200000e+01 : f32
    %102 = vector.broadcast %cst_58 : f32 to vector<16x1xf32>
    %103 = arith.divf %101, %102 : vector<16x1xf32>
    %104 = vector.broadcast %103 : vector<16x1xf32> to vector<16x32xf32>
    %105 = arith.subf %95, %104 : vector<16x32xf32>
    %106 = arith.mulf %105, %105 : vector<16x32xf32>
    %cst_59 = arith.constant dense<0.000000e+00> : vector<16xf32>
    %107 = vector.multi_reduction <add>, %106, %cst_59 [1] : vector<16x32xf32> to vector<16xf32>
    %108 = vector.shape_cast %107 : vector<16xf32> to vector<16x1xf32>
    %cst_60 = arith.constant 3.200000e+01 : f32
    %109 = vector.broadcast %cst_60 : f32 to vector<16x1xf32>
    %110 = arith.divf %108, %109 : vector<16x1xf32>
    %cst_61 = arith.constant 9.99999974E-6 : f32
    %111 = vector.broadcast %cst_61 : f32 to vector<16x1xf32>
    %112 = arith.addf %110, %111 : vector<16x1xf32>
    %113 = math.rsqrt %112 : vector<16x1xf32>
    %114 = vector.broadcast %113 : vector<16x1xf32> to vector<16x32xf32>
    %115 = arith.mulf %105, %114 : vector<16x32xf32>
    %116 = vector.broadcast %97 : vector<1x32xf32> to vector<16x32xf32>
    %117 = arith.mulf %115, %116 : vector<16x32xf32>
    %118 = vector.broadcast %99 : vector<1x32xf32> to vector<16x32xf32>
    %119 = arith.addf %117, %118 : vector<16x32xf32>
    %c0_62 = arith.constant 0 : index
    %c0_63 = arith.constant 0 : index
    %120 = vector.load %arg22[%c0_62, %c0_63] : memref<16x32xf32, #tpu.memory_space<vmem>>, vector<16x32xf32>
    tpu.vector_store %arg22[%c0_62, %c0_63], %119 {strides = array<i32>} : memref<16x32xf32, #tpu.memory_space<vmem>>, vector<16x32xf32>,
    %c1_i32 = arith.constant 1 : i32
    %121 = arith.cmpi eq, %arg1, %c1_i32 : i32
    %122 = arith.extui %121 : i1 to i32
    %c0_i32_64 = arith.constant 0 : i32
    %123 = arith.cmpi ne, %122, %c0_i32_64 : i32
    scf.if %123 {
      %124 = vector.extract_strided_slice %119 {offsets = [0, 0], sizes = [8, 32], strides = [1, 1]} : vector<16x32xf32> to vector<8x32xf32>
      %125 = arith.truncf %124 : vector<8x32xf32> to vector<8x32xbf16>
      %c0_65 = arith.constant 0 : index
      %c0_66 = arith.constant 0 : index
      %126 = vector.load %arg21[%c0_65, %c0_66] : memref<8x32xbf16, #tpu.memory_space<vmem>>, vector<8x32xbf16>
      tpu.vector_store %arg21[%c0_65, %c0_66], %125 {strides = array<i32>} : memref<8x32xbf16, #tpu.memory_space<vmem>>, vector<8x32xbf16>,
    } else {
    }
    return
  }
  func.func @transform_0(%arg0: i32, %arg1: i32) -> (i32, i32) {
    %c0_i32 = arith.constant 0 : i32
    %c0_i32_0 = arith.constant 0 : i32
    return %arg0, %c0_i32 : i32, i32
  }
  func.func @transform_1(%arg0: i32, %arg1: i32) -> (i32, i32) {
    %c0_i32 = arith.constant 0 : i32
    %c0_i32_0 = arith.constant 0 : i32
    %c0_i32_1 = arith.constant 0 : i32
    return %c0_i32, %c0_i32_0 : i32, i32
  }
  func.func @transform_2(%arg0: i32, %arg1: i32) -> (i32, i32) {
    %c0_i32 = arith.constant 0 : i32
    %c0_i32_0 = arith.constant 0 : i32
    %c0_i32_1 = arith.constant 0 : i32
    return %c0_i32, %c0_i32_0 : i32, i32
  }
  func.func @transform_3(%arg0: i32, %arg1: i32) -> (i32, i32) {
    %c0_i32 = arith.constant 0 : i32
    %c0_i32_0 = arith.constant 0 : i32
    %c0_i32_1 = arith.constant 0 : i32
    return %c0_i32, %c0_i32_0 : i32, i32
  }
  func.func @transform_4(%arg0: i32, %arg1: i32) -> (i32, i32) {
    %c0_i32 = arith.constant 0 : i32
    %c0_i32_0 = arith.constant 0 : i32
    %c0_i32_1 = arith.constant 0 : i32
    return %c0_i32, %c0_i32_0 : i32, i32
  }
  func.func @transform_5(%arg0: i32, %arg1: i32) -> (i32, i32) {
    %c0_i32 = arith.constant 0 : i32
    %c0_i32_0 = arith.constant 0 : i32
    %c0_i32_1 = arith.constant 0 : i32
    return %c0_i32, %c0_i32_0 : i32, i32
  }
  func.func @transform_6(%arg0: i32, %arg1: i32) -> (i32, i32) {
    %c0_i32 = arith.constant 0 : i32
    %c0_i32_0 = arith.constant 0 : i32
    %c0_i32_1 = arith.constant 0 : i32
    return %c0_i32, %c0_i32_0 : i32, i32
  }
  func.func @transform_7(%arg0: i32, %arg1: i32) -> (i32, i32, i32) {
    %c0_i32 = arith.constant 0 : i32
    %c0_i32_0 = arith.constant 0 : i32
    %c0_i32_1 = arith.constant 0 : i32
    return %arg1, %c0_i32, %c0_i32_0 : i32, i32, i32
  }
  func.func @transform_8(%arg0: i32, %arg1: i32) -> (i32, i32, i32) {
    %c0_i32 = arith.constant 0 : i32
    %c0_i32_0 = arith.constant 0 : i32
    %c0_i32_1 = arith.constant 0 : i32
    return %arg1, %c0_i32, %c0_i32_0 : i32, i32, i32
  }
  func.func @transform_9(%arg0: i32, %arg1: i32) -> (i32, i32, i32) {
    %c0_i32 = arith.constant 0 : i32
    %c0_i32_0 = arith.constant 0 : i32
    %c0_i32_1 = arith.constant 0 : i32
    return %arg1, %c0_i32, %c0_i32_0 : i32, i32, i32
  }
  func.func @transform_10(%arg0: i32, %arg1: i32) -> (i32, i32, i32) {
    %c0_i32 = arith.constant 0 : i32
    %c0_i32_0 = arith.constant 0 : i32
    %c0_i32_1 = arith.constant 0 : i32
    return %arg1, %c0_i32, %c0_i32_0 : i32, i32, i32
  }
  func.func @transform_11(%arg0: i32, %arg1: i32) -> (i32, i32, i32) {
    %c0_i32 = arith.constant 0 : i32
    %c0_i32_0 = arith.constant 0 : i32
    %c0_i32_1 = arith.constant 0 : i32
    return %arg1, %c0_i32, %c0_i32_0 : i32, i32, i32
  }
  func.func @transform_12(%arg0: i32, %arg1: i32) -> (i32, i32, i32) {
    %c0_i32 = arith.constant 0 : i32
    %c0_i32_0 = arith.constant 0 : i32
    %c0_i32_1 = arith.constant 0 : i32
    return %arg1, %c0_i32, %c0_i32_0 : i32, i32, i32
  }
  func.func @transform_13(%arg0: i32, %arg1: i32) -> (i32, i32, i32) {
    %c0_i32 = arith.constant 0 : i32
    %c0_i32_0 = arith.constant 0 : i32
    %c0_i32_1 = arith.constant 0 : i32
    return %arg1, %c0_i32, %c0_i32_0 : i32, i32, i32
  }
  func.func @transform_14(%arg0: i32, %arg1: i32) -> (i32, i32, i32) {
    %c0_i32 = arith.constant 0 : i32
    %c0_i32_0 = arith.constant 0 : i32
    %c0_i32_1 = arith.constant 0 : i32
    return %arg1, %c0_i32, %c0_i32_0 : i32, i32, i32
  }
  func.func @transform_15(%arg0: i32, %arg1: i32) -> (i32, i32, i32) {
    %c0_i32 = arith.constant 0 : i32
    %c0_i32_0 = arith.constant 0 : i32
    %c0_i32_1 = arith.constant 0 : i32
    return %arg1, %c0_i32, %c0_i32_0 : i32, i32, i32
  }
  func.func @transform_16(%arg0: i32, %arg1: i32) -> (i32, i32, i32) {
    %c0_i32 = arith.constant 0 : i32
    %c0_i32_0 = arith.constant 0 : i32
    %c0_i32_1 = arith.constant 0 : i32
    return %arg1, %c0_i32, %c0_i32_0 : i32, i32, i32
  }
  func.func @transform_17(%arg0: i32, %arg1: i32) -> (i32, i32, i32) {
    %c0_i32 = arith.constant 0 : i32
    %c0_i32_0 = arith.constant 0 : i32
    %c0_i32_1 = arith.constant 0 : i32
    return %arg1, %c0_i32, %c0_i32_0 : i32, i32, i32
  }
  func.func @transform_18(%arg0: i32, %arg1: i32) -> (i32, i32, i32) {
    %c0_i32 = arith.constant 0 : i32
    %c0_i32_0 = arith.constant 0 : i32
    %c0_i32_1 = arith.constant 0 : i32
    return %arg1, %c0_i32, %c0_i32_0 : i32, i32, i32
  }
  func.func @transform_19(%arg0: i32, %arg1: i32) -> (i32, i32) {
    %c0_i32 = arith.constant 0 : i32
    %c0_i32_0 = arith.constant 0 : i32
    return %arg0, %c0_i32 : i32, i32
  }
}

</mosaic_0001>

<bundles_post_ra>
// kernel: tpu_custom_call.1
= control target key start
LH: loop header
LB: loop body
LE: loop exit
PB: predicated region body
PF: predicated region fallthrough
CT: control target
= control target key end

     0   :  { %s3030_s0 = inlined_call_operand.vmem [shape: f32[8,16], index: 0, kind: input, shape index: {}]   ;;  %s3031_s1 = inlined_call_operand.hbm [shape: bf16[16,32], index: 1, kind: input, shape index: {}]   ;;  %s3032_s2 = inlined_call_operand.vmem [shape: f32[1,32], index: 2, kind: input, shape index: {}]   ;;  %s3033_s3 = inlined_call_operand.hbm [shape: f32[1,32], index: 3, kind: input, shape index: {}]   ;;  %s3034_s4 = inlined_call_operand.hbm [shape: f32[2,32], index: 4, kind: input, shape index: {}]   ;;  %s3035_s5 = inlined_call_operand.vmem [shape: bf16[32,4], index: 5, kind: input, shape index: {}]   ;;  %s3036_s6 = inlined_call_operand.hbm [shape: bf16[4,32], index: 6, kind: input, shape index: {}]   ;;  %s3037_s7 = inlined_call_operand.vmem [shape: bf16[2,32,384], index: 7, kind: input, shape index: {}]   ;;  %s3038_s8 = inlined_call_operand.hbm [shape: f32[2,1,384], index: 8, kind: input, shape index: {}]   ;;  %s3039_s9 = inlined_call_operand.vmem [shape: bf16[2,32,32], index: 9, kind: input, shape index: {}]   ;;  %s3040_s10 = inlined_call_operand.hbm [shape: f32[2,1,32], index: 10, kind: input, shape index: {}]   ;;  %s3041_s11 = inlined_call_operand.vmem [shape: bf16[2,32,128], index: 11, kind: input, shape index: {}]   ;;  %s3042_s12 = inlined_call_operand.hbm [shape: f32[2,1,128], index: 12, kind: input, shape index: {}]   ;;  %s3043_s13 = inlined_call_operand.vmem [shape: bf16[2,128,32], index: 13, kind: input, shape index: {}]   ;;  %s3044_s14 = inlined_call_operand.vmem [shape: f32[2,1,32], index: 14, kind: input, shape index: {}]   ;;  %s3045_s15 = inlined_call_operand.hbm [shape: f32[2,1,32], index: 15, kind: input, shape index: {}]   ;;  %s3046_s16 = inlined_call_operand.vmem [shape: f32[2,1,32], index: 16, kind: input, shape index: {}]   ;;  %s3047_s17 = inlined_call_operand.vmem [shape: f32[2,1,32], index: 17, kind: input, shape index: {}]   ;;  %s3048_s18 = inlined_call_operand.vmem [shape: f32[2,1,32], index: 18, kind: input, shape index: {}]   ;;  %s3049_s19 = inlined_call_operand.hbm [shape: bf16[8,32], index: 19, kind: output, shape index: {}]  }
   0x1   :  { %3059 = sst [smem:[#allocation26_spill]] %s3030_s0 }
   0x2   :  { %3060 = sst [smem:[#allocation27_spill]] %s3031_s1 }
   0x3   :  { %3061 = sst [smem:[#allocation28_spill]] %s3032_s2 }
   0x4   :  { %3062 = sst [smem:[#allocation29_spill]] %s3033_s3 }
   0x5   :  { %3063 = sst [smem:[#allocation30_spill]] %s3034_s4 }
   0x6   :  { %3064 = sst [smem:[#allocation31_spill]] %s3035_s5 }
   0x7   :  { %3065 = sst [smem:[#allocation32_spill]] %s3036_s6 }
   0x8   :  { %3066 = sst [smem:[#allocation33_spill]] %s3037_s7 }
   0x9   :  { %3067 = sst [smem:[#allocation34_spill]] %s3038_s8 }
   0xa   :  { %3068 = sst [smem:[#allocation35_spill]] %s3039_s9 }
   0xb   :  { %3069 = sst [smem:[#allocation36_spill]] %s3040_s10 }
   0xc   :  { %3070 = sst [smem:[#allocation37_spill]] %s3041_s11 }
   0xd   :  { %3071 = sst [smem:[#allocation38_spill]] %s3042_s12 }
   0xe   :  { %3072 = sst [smem:[#allocation39_spill]] %s3043_s13 }
   0xf   :  { %3073 = sst [smem:[#allocation40_spill]] %s3044_s14 }
  0x10   :  { %3074 = sst [smem:[#allocation41_spill]] %s3045_s15 }
  0x11   :  { %3075 = sst [smem:[#allocation42_spill]] %s3046_s16 }
  0x12   :  { %3076 = sst [smem:[#allocation43_spill]] %s3047_s17 }
  0x13   :  { %3077 = sst [smem:[#allocation44_spill]] %s3048_s18 }
  0x14   :  { %3078 = sst [smem:[#allocation45_spill]] %s3049_s19 }
  0x15   :  { %24 = vsyncpa [#allocation4], 0 }
  0x16   :  { %25 = vsyncpa [#allocation7], 0 }
  0x17   :  { %26 = vsyncpa [#allocation10], 0 }
  0x18   :  { %27 = vsyncpa [#allocation5], 0  ;;  %s2654_s0 = smov 0   ;;  %s2656_s30 = smov 0  }
  0x19   :  { %s2658_s20 = smov 0   ;;  %s2660_s21 = smov 0  }
  0x1a   :  { %s2662_s1 = smov 0   ;;  %s2664_s22 = smov 0  }
  0x1b LB: > { %3079 = sst [smem:[#allocation21_spill]] %s2524_s20  ;;  %s2683_s2 = sadd.s32 4294967295, %s2536_s22   ;;  %s2536_s22 = sphi %s2664_s22, %s33_s22   ;;  %s2532_s1 = sphi %s2662_s1, %s3126_s1   ;;  %s2528_s21 = sphi %s2660_s21, %s3125_s21   ;;  %s2524_s20 = sphi %s2658_s20, %s3124_s20   ;;  %s2520_s30 = sphi %s2656_s30, %s3128_s30   ;;  %s2516_s0 = sphi %s2654_s0, %s3127_s0  }
  0x1c   : > { %3080 = sst [smem:[#allocation22_spill]] %s2532_s1  ;;  %p243_p0 = scmp.ne.s32.totalorder %s2520_s30, %s2516_s0 }
  0x1d   : > { %3081 = sst [smem:[#allocation23_spill]] %s2536_s22  ;;  %p3054_p1 = scmp.eq.s32.totalorder %s2683_s2, 0 }
  0x1e   : > { %p1904_p2 = scmp.ge.s32.totalorder %s2536_s22, 1  ;;  %p540_p3 = scmp.lt.s32.totalorder %s2536_s22, 3 }
  0x1f   : > { %p2691_p4 = por %p3054_p1, %p243_p0  ;;  %s2538_s25 = smov [#allocation3]  }
  0x20   : > { %p2695_p5 = pnand %p1904_p2, %p540_p3  ;;  %s559_s3 = sshll.u32 %s2538_s25, 4  ;;  %s560_s3 = int_to_ptr.vmem [resolvable:$true] %s559_s3 }
  0x21   : > { %s3082_s23 = scalar_select %p2691_p4, 1, 0 }
  0x22   : > { %s3083_s24 = scalar_select %p2695_p5, 1, 0 }
  0x23   : > { %p2094_p6 = pneg %p2695_p5  ;;  %s42_s27 = sadd.s32 1, %s2532_s1 }
  0x24   : > { %s2241_s28 = scalar_lea.vmem %s560_s3, 128  ;;  %p2249_p12 = scmp.lt.s32.totalorder %s560_s3, %s560_s3 }
  0x25   : > { %p2703_p7 = pnand %p2094_p6, %p3054_p1  ;;  %p2242_p9 = scmp.ne.s32.totalorder %s560_s3, %s2241_s28 }
  0x26   : > { %p2250_p13 = scmp.lt.s32.totalorder %s2241_s28, %s2241_s28 }
  0x27   : > { %p2232_p8 = pneg %p2703_p7 }
  0x28   : > { %p2251_p0 = por %p2250_p13, %p2249_p12 }
  0x29   : > { %p2244_p10 = pnand %p2242_p9, %p2232_p8 }
  0x2b   : > { %p2245_p11 = pneg %p2244_p10 }
  0x2d   : > { %p2252_p2 = pnand %p2251_p0, %p2245_p11 }
  0x2f   : > { %2255 = shalt.err (!%p2252_p2)
}
  0x30   : > { %s2539_s29 = smov 64   ;;  %s2540_s0 = smov 4  }
  0x31   : > { %s3085_s28 = sld [smem:[#allocation27_spill]]  ;;  %p43_p3 = scmp.ge.s32.totalorder %s42_s27, 2 }
  0x32   : > { %s230_s5 = sadd.s32 1, %s2524_s20  ;;  %p237_p6 = scmp.ne.s32.totalorder %s2524_s20, %s2520_s30 }
  0x33   : > { %p238_p9 = scmp.eq.s32.totalorder %s2536_s22, 0  ;;  %s3130_s27 = smov (%p43_p3, %s42_s27), 0 }
  0x34   : > { %3086 = sst [smem:[#allocation24_spill]] %s3130_s27  ;;  %p2124_p11 = scmp.lt.s32.totalorder %s2536_s22, 2 }
  0x35   : > { %p239_p10 = por %p238_p9, %p237_p6  ;;  %s227_s18 = ssub.s32 %s2532_s1, %s3130_s27 }
  0x36   : > { %s620_s17 = sand.u32 1, %s2536_s22   ;;  %p228_p12 = scmp.eq.s32.totalorder %s227_s18, 0 }
  0x37   : > { %2097 = dma.hbm_to_vmem [thread:$0]  (!%p2703_p7), %s3085_s28, 128, %s560_s3, [#allocation4], %s2539_s29, %s2539_s29, %s2540_s0  }
  0x38   : > { %s2729_s16 = sand.u32 1, %s2524_s20   ;;  %s2063_s14 = smul.u32 48, %s2532_s1 }
  0x39   : > { %s2733_s13 = scalar_select %p228_p12, %s2524_s20, %s230_s5  }
  0x3a   : > { %s2062_s19 = smul.u32 3, %s2729_s16  ;;  %s3088_s8 = sld [smem:[#allocation34_spill]] }
  0x3b   : > { %3087 = sst [smem:[#allocation25_spill]] %s2733_s13  ;;  %p2739_p13 = pnand %p2124_p11, %p239_p10 }
  0x3c   : > { %s2744_s28 = sshll.u32 %s2532_s1, 4  ;;  %s624_s18 = scalar_lea.vmem [#allocation11], %s2062_s19 }
  0x3d   : > { %s632_s27 = sshll.u32 %s624_s18, 4  ;;  %s3090_s10 = sld [smem:[#allocation36_spill]]  ;;  %s633_s27 = int_to_ptr.vmem [resolvable:$true] %s632_s27 }
  0x3e   : > { %s2750_s20 = scalar_lea.sflag [#allocation4], %s620_s17  ;;  %p3055_p0 = pneg %p2739_p13 }
  0x3f   : > { %s2541_s3 = smov [#allocation11]  }
  0x40   : > { %s630_s0 = scalar_lea.hbm %s3088_s8, %s2063_s14  ;;  %s2269_s14 = scalar_lea.vmem %s633_s27, 48 }
  0x41   : > { %p2270_p2 = scmp.ne.s32.totalorder %s633_s27, %s2269_s14  ;;  %s2274_s29 = sshll.u32 %s2541_s3, 4  ;;  %s2275_s29 = int_to_ptr.vmem [resolvable:$false] %s2274_s29 }
  0x42   : > { %s2276_s19 = scalar_lea.vmem %s2275_s29, 96  ;;  %p2277_p9 = scmp.lt.s32.totalorder %s633_s27, %s2275_s29 }
  0x43   : > { %p2272_p3 = pnand %p2270_p2, %p3055_p0  ;;  %p2278_p10 = scmp.lt.s32.totalorder %s2276_s19, %s2269_s14 }
  0x45   : > { %p2273_p6 = pneg %p2272_p3  ;;  %p2279_p11 = por %p2278_p10, %p2277_p9 }
  0x47   : > { %p2280_p12 = pnand %p2279_p11, %p2273_p6 }
  0x49   : > { %2283 = shalt.err (!%p2280_p12)
}
  0x4a   : > { %2110 = dma.hbm_to_vmem [thread:$0]  (!%p2739_p13), %s630_s0, 48, %s633_s27, %s2750_s20  }
  0x4b   : > { %s650_s17 = scalar_lea.vmem [#allocation12], %s2729_s16  ;;  %s2542_s18 = smov [#allocation6]  }
  0x4c   : > { %s657_s22 = sshll.u32 %s650_s17, 4  ;;  %s576_s5 = sshll.u32 %s2542_s18, 4  ;;  %s658_s22 = int_to_ptr.vmem [resolvable:$true] %s657_s22  ;;  %s577_s5 = int_to_ptr.vmem [resolvable:$true] %s576_s5 }
  0x4d   : > { %s2297_s13 = scalar_lea.vmem %s658_s22, 16  ;;  %s2543_s14 = smov [#allocation12]  }
  0x4e   : > { %p2298_p2 = scmp.ne.s32.totalorder %s658_s22, %s2297_s13  ;;  %s2302_s3 = sshll.u32 %s2543_s14, 4  ;;  %s2303_s3 = int_to_ptr.vmem [resolvable:$false] %s2302_s3 }
  0x4f   : > { %s2304_s29 = scalar_lea.vmem %s2303_s3, 32  ;;  %p2305_p6 = scmp.lt.s32.totalorder %s658_s22, %s2303_s3 }
  0x50   : > { %p2300_p3 = pnand %p2298_p2, %p3055_p0  ;;  %p2306_p9 = scmp.lt.s32.totalorder %s2304_s29, %s2297_s13 }
  0x52   : > { %p2301_p1 = pneg %p2300_p3  ;;  %p2307_p10 = por %p2306_p9, %p2305_p6 }
  0x54   : > { %p2308_p11 = pnand %p2307_p10, %p2301_p1 }
  0x56   : > { %2311 = shalt.err (!%p2308_p11)
}
  0x57   : > { %s3091_s19 = scalar_lea.hbm %s3090_s10, %s2744_s28  ;;  %s2323_s17 = scalar_lea.vmem %s577_s5, 16 }
  0x58   : > { %2113 = dma.hbm_to_vmem [thread:$0]  (!%p2739_p13), %s3091_s19, 16, %s658_s22, %s2750_s20  }
  0x59   : > { %p2324_p12 = scmp.ne.s32.totalorder %s577_s5, %s2323_s17  ;;  %s2330_s13 = scalar_lea.vmem %s577_s5, 32 }
  0x5a   : > { %p2331_p1 = scmp.lt.s32.totalorder %s577_s5, %s577_s5  ;;  %p2332_p6 = scmp.lt.s32.totalorder %s2330_s13, %s2323_s17 }
  0x5b   : > { %p2326_p2 = pnand %p2324_p12, %p2232_p8 }
  0x5c   : > { %p2333_p9 = por %p2332_p6, %p2331_p1 }
  0x5d   : > { %p2327_p3 = pneg %p2326_p2 }
  0x5f   : > { %p2334_p10 = pnand %p2333_p9, %p2327_p3 }
  0x61   : > { %2337 = shalt.err (!%p2334_p10)
}
  0x62   : > { %s3092_s3 = sld [smem:[#allocation29_spill]]  ;;  %s675_s0 = scalar_lea.vmem [#allocation13], %s2729_s16 }
  0x63   : > { %s3093_s12 = sld [smem:[#allocation38_spill]]  ;;  %s682_s19 = sshll.u32 %s675_s0, 4  ;;  %s683_s19 = int_to_ptr.vmem [resolvable:$true] %s682_s19 }
  0x64   : > { %s2351_s17 = scalar_lea.vmem %s683_s19, 16  ;;  %s2544_s13 = smov [#allocation13]  }
  0x65   : > { %p2352_p11 = scmp.ne.s32.totalorder %s683_s19, %s2351_s17  ;;  %s2356_s8 = sshll.u32 %s2544_s13, 4  ;;  %s2357_s8 = int_to_ptr.vmem [resolvable:$false] %s2356_s8 }
  0x66   : > { %s2358_s18 = scalar_lea.vmem %s2357_s8, 32  ;;  %p2359_p3 = scmp.lt.s32.totalorder %s683_s19, %s2357_s8 }
  0x67   : > { %p2354_p12 = pnand %p2352_p11, %p3055_p0  ;;  %p2360_p1 = scmp.lt.s32.totalorder %s2358_s18, %s2351_s17 }
  0x68   : > { %2100 = dma.hbm_to_vmem [thread:$0]  (!%p2703_p7), %s3092_s3, 16, %s577_s5, [#allocation7]  }
  0x69   : > { %s680_s27 = scalar_lea.hbm %s3093_s12, %s2744_s28  ;;  %p2355_p2 = pneg %p2354_p12 }
  0x6a   : > { %p2361_p6 = por %p2360_p1, %p2359_p3 }
  0x6c   : > { %p2362_p9 = pnand %p2361_p6, %p2355_p2 }
  0x6e   : > { %2365 = shalt.err (!%p2362_p9)
}
  0x6f   : > { %2116 = dma.hbm_to_vmem [thread:$0]  (!%p2739_p13), %s680_s27, 16, %s683_s19, %s2750_s20  }
  0x70   : > { %s2545_s5 = smov [#allocation8]   ;;  %s2546_s3 = smov [#allocation9]  }
  0x71   : > { %s587_s14 = sshll.u32 %s2545_s5, 4  ;;  %s601_s22 = sshll.u32 %s2546_s3, 4  ;;  %s588_s14 = int_to_ptr.vmem [resolvable:$true] %s587_s14  ;;  %s602_s22 = int_to_ptr.vmem [resolvable:$true] %s601_s22 }
  0x72   : > { %s2377_s29 = scalar_lea.vmem %s588_s14, 32  ;;  %p2385_p0 = scmp.lt.s32.totalorder %s588_s14, %s588_s14 }
  0x73   : > { %p2378_p10 = scmp.ne.s32.totalorder %s588_s14, %s2377_s29  ;;  %p2386_p3 = scmp.lt.s32.totalorder %s2377_s29, %s2377_s29 }
  0x75   : > { %p2380_p11 = pnand %p2378_p10, %p2232_p8  ;;  %p2387_p2 = por %p2386_p3, %p2385_p0 }
  0x77   : > { %p2381_p12 = pneg %p2380_p11 }
  0x79   : > { %p2388_p1 = pnand %p2387_p2, %p2381_p12 }
  0x7b   : > { %2391 = shalt.err (!%p2388_p1)
}
  0x7c   : > { %s3094_s4 = sld [smem:[#allocation30_spill]]  ;;  %s2403_s0 = scalar_lea.vmem %s602_s22, 32 }
  0x7d   : > { %p2404_p6 = scmp.ne.s32.totalorder %s602_s22, %s2403_s0  ;;  %p2411_p11 = scmp.lt.s32.totalorder %s602_s22, %s602_s22 }
  0x7e   : > { %p2412_p4 = scmp.lt.s32.totalorder %s2403_s0, %s2403_s0 }
  0x7f   : > { %p2406_p9 = pnand %p2404_p6, %p2232_p8 }
  0x80   : > { %p2413_p5 = por %p2412_p4, %p2411_p11 }
  0x81   : > { %p2407_p10 = pneg %p2406_p9 }
  0x82   : > { %2103 = dma.hbm_to_vmem [thread:$0]  (!%p2703_p7), %s3094_s4, 32, %s588_s14, [#allocation7]  }
  0x83   : > { %p2414_p0 = pnand %p2413_p5, %p2407_p10 }
  0x85   : > { %2417 = shalt.err (!%p2414_p0)
}
  0x86   : > { %s3095_s6 = sld [smem:[#allocation32_spill]]  ;;  %s706_s14 = scalar_lea.vmem [#allocation14], %s2729_s16 }
  0x87   : > { %s3096_s15 = sld [smem:[#allocation41_spill]]  ;;  %s713_s3 = sshll.u32 %s706_s14, 4  ;;  %s714_s3 = int_to_ptr.vmem [resolvable:$true] %s713_s3 }
  0x88   : > { %s2431_s29 = scalar_lea.vmem %s714_s3, 16  ;;  %p3097_p5 = pneg %p2739_p13 }
  0x89   : > { %p2432_p4 = scmp.ne.s32.totalorder %s714_s3, %s2431_s29  ;;  %s2547_s26 = smov [#allocation14]  }
  0x8a   : > { %s2436_s8 = sshll.u32 %s2547_s26, 4  ;;  %s2437_s8 = int_to_ptr.vmem [resolvable:$false] %s2436_s8 }
  0x8b   : > { %p2434_p8 = pnand %p2432_p4, %p3097_p5  ;;  %s2438_s27 = scalar_lea.vmem %s2437_s8, 32 }
  0x8c   : > { %2106 = dma.hbm_to_vmem [thread:$0]  (!%p2703_p7), %s3095_s6, 32, %s602_s22, [#allocation10]  }
  0x8d   : > { %s711_s5 = scalar_lea.hbm %s3096_s15, %s2744_s28  ;;  %p2435_p12 = pneg %p2434_p8 }
  0x8e   : > { %p2439_p3 = scmp.lt.s32.totalorder %s714_s3, %s2437_s8  ;;  %p2440_p2 = scmp.lt.s32.totalorder %s2438_s27, %s2431_s29 }
  0x90   : > { %p2441_p7 = por %p2440_p2, %p2439_p3 }
  0x92   : > { %p2442_p1 = pnand %p2441_p7, %p2435_p12 }
  0x94   : > { %2445 = shalt.err (!%p2442_p1)
}
  0x95   : > { %2119 = dma.hbm_to_vmem [thread:$0]  (!%p2739_p13), %s711_s5, 16, %s714_s3, %s2750_s20  }
  0x96   : > { %p3098_p6 = scmp.ne.s32.totalorder %s3083_s24, 0 }
  0x97   : > { %p3099_p9 = scmp.eq.s32.totalorder (!%p3098_p6), %s2683_s2, 0 }
  0x98   : > { %740 = sbr.rel (%p3098_p6) target bundleno = 2295 (0x8f7), region = 96 }
  0x9d   : > { %2495 = dma.done.wait (%p3099_p9), [#allocation4], 128   ;;  %p3100_p10 = pmov %p3099_p9 }
  0x9e   : > { %p3101_p11 = pmov %p3099_p9 }
  0x9f   : > { %2497 = vsyncadd (%p3100_p10), [#allocation4], 4294967168 }
  0xa0   : > { %2499 = dma.done.wait (%p3101_p11), [#allocation7], 48   ;;  %p3102_p0 = pmov %p3099_p9 }
  0xa2   : > { %2501 = vsyncadd (%p3102_p0), [#allocation7], 4294967248  ;;  %p3103_p4 = pmov %p3102_p0 }
  0xa3   : > { %p3104_p13 = pmov %p3102_p0 }
  0xa4   : > { %2503 = dma.done.wait (%p3103_p4), [#allocation10], 32  }
  0xa5   : > { %2505 = vsyncadd (%p3104_p13), [#allocation10], 4294967264  ;;  %s758_s16 = sand.u32 1, %s2683_s2   ;;  %s2834_s20 = sand.u32 1, %s2520_s30  }
  0xa6   : > { %s2064_s24 = smul.u32 3, %s2834_s20  ;;  %s759_s25 = scalar_lea.sflag [#allocation4], %s758_s16 }
  0xa7   : > { %p3105_p5 = scmp.ne.s32.totalorder %s3082_s23, 0 }
  0xa8   : > { %s2837_s28 = scalar_lea.vmem [#allocation11], %s2064_s24 }
  0xa9   : > { %2507 = dma.done.wait (%p3105_p5), %s759_s25, 96  }
  0xaa   : > { %2509 = vsyncadd (%p3105_p5), %s759_s25, 4294967200  ;;  %p888_p8 = scmp.lt.s32.totalorder %s2528_s21, 1  ;;  %s3106_s9 = sld [smem:[#allocation35_spill]] }
  0xab   : > { %s3107_s11 = sld [smem:[#allocation37_spill]]  ;;  %s770_s1 = scalar_lea.vmem [#allocation12], %s2834_s20 }
  0xac   : > { %s2845_s22 = scalar_select %p888_p8, %s2528_s21, 1 }
  0xad   : > { %s3108_s7 = sld [smem:[#allocation33_spill]]  ;;  %s778_s27 = scalar_lea.vmem [#allocation13], %s2834_s20 }
  0xae   : > { %s2065_s0 = smul.u32 48, %s2845_s22  ;;  %s1970_s19 = sshll.u32 %s2845_s22, 4 }
  0xaf   : > { %s1972_s8 = sshll.u32 %s2845_s22, 6  ;;  %s3109_s24 = sld [smem:[#allocation39_spill]] }
  0xb0   : > { %s2852_s13 = scalar_lea.vmem %s3106_s9, %s1970_s19  ;;  %s3110_s23 = sld [smem:[#allocation40_spill]] }
  0xb1   : > { %s2857_s14 = scalar_lea.vmem %s3107_s11, %s1970_s19  ;;  %s3111_s18 = sld [smem:[#allocation42_spill]] }
  0xb2   : > { %s3112_s12 = sld [smem:[#allocation43_spill]]  ;;  %p1927_p12 = scmp.ne.s32.totalorder %s2528_s21, 0 }
  0xb3   : > { %s2862_s26 = scalar_lea.vmem %s3108_s7, %s2065_s0  ;;  %s3113_s7 = sld [smem:[#allocation44_spill]] }
  0xb4   : > { %s3114_s10 = sld [smem:[#allocation26_spill]] (!%p1927_p12) }
  0xb5   : > { %s2868_s25 = scalar_lea.vmem %s3109_s24, %s1972_s8  ;;  %s786_s8 = scalar_lea.vmem [#allocation14], %s2834_s20 }
  0xb6   : > { %s910_s6 = scalar_lea.vmem %s3110_s23, %s2845_s22  ;;  %924 = sbr.rel (%p1927_p12) target bundleno = 391 (0x187), region = 132 }
  0xb7   : > { %s913_s19 = scalar_lea.vmem %s3111_s18, %s2845_s22 }
  0xb8   : > { %s916_s3 = scalar_lea.vmem %s3112_s12, %s2845_s22  ;;  %s3115_s12 = sld [smem:[#allocation28_spill]] (!%p1927_p12) }
  0xb9   : > { %s919_s15 = scalar_lea.vmem %s3113_s7, %s2845_s22 }
  0xbb   : > { %v2191_v0 = vld [vmem:[#allocation3] sm:$0xff]   ;;  %v929_v1 = vlaneseq  ;;  %v2548_v2 = vmov 0.0   ;;  %v936_v3 = vld [vmem:[%s3114_s10] sm:$0xff]  ;;  %v925_v4 = vld [vmem:[#allocation6] sm:$0x1]  ;;  %vm2549_vm0 = vmmov 0  }
  0xbc   : > { %1998 = vmatprep.subr.bf16.mxu0 %v2548_v2  ;;  %2000 = vmatprep.mubr.msk.bf16.mxu0 %vm2549_vm0, %v2548_v2  ;;  %v937_v5 = vpack.c.bf16 %v936_v3, %v936_v3  ;;  %vm953_vm1 = vcmask 130048   ;;  %v926_v6 = vld [vmem:[#allocation8] sm:$0x1]  ;;  %vm934_vm2 = vcmask 261120   ;;  %v1931_v13 = vld [vmem:[#allocation8 + $0x1] ss:$0 sm:$0xff] }
  0xbd   : > { %1999 = vmatpush3.bf16.msra.mxu0 %v2191_v0  ;;  %v930_v7 = vshrl.u32 %v929_v1, 7  ;;  %v927_v8 = vadd.f32 %v926_v6, %v925_v4 }
  0xbe   : > { %v1928_v11 = vld [vmem:[%s3115_s12] ss:$0 sm:$0xff] }
  0xbf   : > { %v931_v9 = vsub.s32 0, %v930_v7 }
  0xc0   : > { %2001 = vmatmul.mubr.msk.bf16.vlgmr.msra.gmra.mxu0 %vm953_vm1, %v937_v5 }
  0xc1   : > { %v932_v10 = vrot.slane %v927_v8, %v931_v9 }
  0xc3   : > { %935 = vst.msk [vmem:[#allocation2] sm:$0xff] %vm934_vm2, %v932_v10 }
 0x180   : > { %v991_v12 = vpop.f32.mrf.mxu0 }
 0x181   : > { %v992_v14 = vadd.f32 %v1928_v11, %v991_v12 }
 0x182   : > { %v2002_v15 = vpop.f32.mrf.mxu0 }
 0x183   : > { %v1002_v16 = vadd.f32 %v1931_v13, %v992_v14 }
 0x184   : > { %v994_v17 = vpop.f32.mrf.mxu0 }
 0x185   : > { %1003 = vst.msk [vmem:[#allocation2 + $0x8] sm:$0xff] %vm934_vm2, %v1002_v16 }
 0x186   : > { %v2003_v18 = vpop.f32.mrf.mxu0 }
 0x187 PF: > { %v2192_v19 = vld [vmem:[%s2862_s26 + $0x1c] ss:$12 sps:$4 sm:$0xff]   ;;  %v2194_v20 = vld [vmem:[%s2862_s26 + $0x18] ss:$12 sps:$4 sm:$0xff]   ;;  %v2550_v21 = vmov 0   ;;  %v2551_v25 = vmov 0.0   ;;  %v1017_v32 = vlaneseq }
 0x188   : > { %1100 = vmatprep.mubr.bf16.mxu1 %v2550_v21  ;;  %1080 = vmatprep.subr.bf16.mxu1 %v2192_v19  ;;  %v2195_v22 = vld [vmem:[%s2862_s26 + $0x4] ss:$12 sps:$4 sm:$0xff]   ;;  %v2197_v23 = vld [vmem:[%s2862_s26] ss:$12 sps:$4 sm:$0xff]   ;;  %vm1064_vm3 = vcmask 261120   ;;  %vm2552_vm4 = vmmov 0  }
 0x189   : > { %v2900_v24 = vld [vmem:[#allocation2] sm:$0xff]  ;;  %2026 = vmatprep.subr.bf16.mxu0 %v2551_v25  ;;  %1081 = vmatpush1.bf16.msra.mxu1 %v2194_v20  ;;  %v2199_v29 = vld [vmem:[%s2862_s26 + $0x8] ss:$12 sps:$4 sm:$0xff]   ;;  %s3116_s24 = sld [smem:[#allocation31_spill]]  ;;  %v1018_v33 = vshrl.u32 %v1017_v32, 7  ;;  %vm1241_vm5 = vcmask 1041408  }
 0x18a   : > { %1082 = vmatprep.subr.bf16.mxu1 %v2195_v22  ;;  %v2198_v27 = vld [vmem:[%s2862_s26 + $0x20] ss:$12 sps:$4 sm:$0xff]   ;;  %2030 = vmatprep.mubr.msk.bf16.mxu0 %vm2552_vm4, %v2551_v25  ;;  %v1236_v62 = vld [vmem:[#allocation9] sm:$0x3]  ;;  %vm1237_vm8 = vcmask 31744   ;;  %p1965_p3 = scmp.ne.s32.totalorder %s2528_s21, 1 }
 0x18b   : > { %v1023_v34 = vsub.s32 1, %v1018_v33  ;;  %v1019_v36 = vsub.s32 0, %v1018_v33  ;;  %v1015_v37 = vld [vmem:[%s2837_s28] sm:$0x7]  ;;  %v1027_v52 = vsub.s32 2, %v1018_v33  ;;  %v1243_v63 = vsel %vm1241_vm5, %v1236_v62, 0 }
 0x18c   : > { %v2903_v26 = vld [vmem:[#allocation2 + $0x8] sm:$0xff]  ;;  %v2203_v22 = vld [vmem:[%s2852_s13] sm:$0xff]  }
 0x18d   : > { %v1006_v28 = vpack.c.bf16 %v2903_v26, %v2900_v24  ;;  %1083 = vmatpush1.bf16.msra.mxu1 %v2197_v23  ;;  %v1024_v39 = vrot.slane %v1015_v37, %v1023_v34  ;;  %v1020_v41 = vrot.slane %v1015_v37, %v1019_v36  ;;  %v1028_v54 = vrot.slane %v1015_v37, %v1027_v52  ;;  %v2202_v21 = vld [vmem:[%s2852_s13 + $0x8] sm:$0xff]  }
 0x18e   : > { %2004 = vmatprep.subr.bf16.mxu1 %v2551_v25  ;;  %2027 = vmatpush3.bf16.msra.mxu0 %v2202_v21 }
 0x18f   : > { %v2200_v30 = vld [vmem:[%s3116_s24 + $0x8] sm:$0xff]   ;;  %v2201_v31 = vld [vmem:[%s3116_s24] sm:$0xff]   ;;  %2028 = vmatprep.subr.bf16.mxu0 %v2551_v25 }
 0x190   : > { %1938 = vmatmul.mubr.msk.bf16.vlgmr.msra.gmra.mxu1 %vm1064_vm3, %v1006_v28 }
 0x191   : > { %2005 = vmatpush3.bf16.msra.mxu1 %v2198_v27  ;;  %2008 = vmatprep.mubr.msk.bf16.mxu1 %vm2552_vm4, %v2551_v25 }
 0x192   : > { %2006 = vmatprep.subr.bf16.mxu1 %v2551_v25  ;;  %2029 = vmatpush3.bf16.msra.mxu0 %v2203_v22 }
 0x193   : > { %2042 = vmatprep.subr.bf16.mxu0 %v2551_v25 }
 0x195   : > { %2007 = vmatpush3.bf16.msra.mxu1 %v2199_v29 }
 0x196   : > { %2012 = vmatprep.subr.bf16.mxu1 %v2551_v25 }
 0x198   : > { %2009 = vmatmul.mubr.msk.bf16.vlgmr.msra.gmra.mxu1 %vm1064_vm3, %v1006_v28 }
 0x199   : > { %2016 = vmatprep.mubr.msk.bf16.mxu1 %vm2552_vm4, %v2551_v25  ;;  %2013 = vmatpush3.bf16.msra.mxu1 %v2200_v30 }
 0x19a   : > { %2014 = vmatprep.subr.bf16.mxu1 %v2551_v25 }
 0x19d   : > { %2015 = vmatpush3.bf16.msra.mxu1 %v2201_v31 }
 0x19e   : > { %2020 = vmatprep.subr.bf16.mxu1 %v2551_v25 }
 0x250   : > { %v1102_v35 = vpop.f32.mrf.mxu1 }
 0x251   : > { %v1103_v45 = vadd.f32 %v1102_v35, %v1020_v41  ;;  %v1944_v35 = vld [vmem:[%s770_s1] ss:$0 sm:$0xff] }
 0x252   : > { %v1104_v38 = vpop.f32.mrf.mxu1 }
 0x253   : > { %v1105_v43 = vadd.f32 %v1104_v38, %v1024_v39 }
 0x254   : > { %v1106_v40 = vpop.f32.mrf.mxu1 }
 0x255   : > { %v1107_v46 = vadd.f32 %v1106_v40, %v1020_v41 }
 0x256   : > { %v1108_v42 = vpop.f32.mrf.mxu1 }
 0x257   : > { %v1109_v44 = vadd.f32 %v1108_v42, %v1024_v39 }
 0x258   : > { %v1145_v53 = vpop.f32.mrf.mxu1 }
 0x259   : > { %v1152_v47 = vsub.f32 %v1109_v44, %v1105_v43  ;;  %v1153_v48 = vsub.f32 %v1105_v43, %v1109_v44  ;;  %v1146_v57 = vadd.f32 %v1145_v53, %v1028_v54 }
 0x25a   : > { %v2010_v55 = vpop.f32.mrf.mxu1 }
 0x25b   : > { %v1154_v49 = vmul.f32 %v1152_v47, %v1103_v45  ;;  %v1155_v50 = vmul.f32 %v1153_v48, %v1107_v46  ;;  %v2205_v55 = vld [vmem:[%s2857_s14] sm:$0xff]  }
 0x25c   : > { %v1148_v56 = vpop.f32.mrf.mxu1 }
 0x25d   : > { %v1156_v51 = vpack.c.bf16 %v1155_v50, %v1154_v49  ;;  %v1149_v58 = vadd.f32 %v1148_v56, %v1028_v54  ;;  %v2204_v54 = vld [vmem:[%s2857_s14 + $0x8] sm:$0xff]   ;;  %v2206_v56 = vld [vmem:[%s2868_s25 + $0x38] sm:$0xff]  }
 0x25e   : > { %v2011_v59 = vpop.f32.mrf.mxu1 }
 0x25f   : > { %2017 = vmatmul.mubr.msk.bf16.vlgmr.msra.gmra.mxu1 %vm1064_vm3, %v1156_v51  ;;  %v1286_v60 = vsub.f32 %v1146_v57, %v1149_v58  ;;  %v1287_v61 = vsub.f32 %v1149_v58, %v1146_v57  ;;  %v2209_v59 = vld [vmem:[%s2868_s25 + $0x20] sm:$0xff]  }
 0x260   : > { %2022 = vmatprep.mubr.msk.bf16.mxu1 %vm2552_vm4, %v2551_v25  ;;  %2021 = vmatpush3.bf16.msra.mxu1 %v1243_v63 }
 0x261   : > { %2034 = vmatprep.subr.bf16.mxu1 %v2551_v25 }
 0x31f   : > { %v1210_v0 = vpop.f32.mrf.mxu1 }
 0x320   : > { %v1217_v1 = vand.u32 2147483647, %v1210_v0  ;;  %vm1225_vm6 = vcmp.ge.f32.partialorder %v1210_v0, 0.0 }
 0x321   : > { %v2018_v2 = vpop.f32.mrf.mxu1 }
 0x322   : > { %v1219_v3 = vsub.f32 0.0, %v1217_v1 }
 0x323   : > { %v1213_v4 = vpop.f32.mrf.mxu1 }
 0x324   : > { %v1221_v5 = vmul.f32 1.442695, %v1219_v3  ;;  %v1218_v6 = vand.u32 2147483647, %v1213_v4  ;;  %vm1226_vm7 = vcmp.ge.f32.partialorder %v1213_v4, 0.0 }
 0x325   : > { %v2019_v7 = vpop.f32.mrf.mxu1 }
 0x326   : > { %2214 = vpow2.f32 %v1221_v5  ;;  %v1220_v8 = vsub.f32 0.0, %v1218_v6  ;;  %v1948_v5 = vld [vmem:[%s786_s8] ss:$0 sm:$0xff] }
 0x328   : > { %v1223_v9 = vmul.f32 1.442695, %v1220_v8 }
 0x32a   : > { %2216 = vpow2.f32 %v1223_v9  ;;  %v1949_v9 = vld [vmem:[%s913_s19] ss:$0 sm:$0xff] }
 0x333   : > { %v2215_v10 = vpop.eup %2214 }
 0x334   : > { %v1229_v11 = vadd.f32 1.0, %v2215_v10  ;;  %v1227_v16 = vsel %vm1225_vm6, %v2215_v10, 1.0 }
 0x336   : > { %2218 = vrcp.f32 %v1229_v11 }
 0x337   : > { %v2217_v12 = vpop.eup %2216 }
 0x338   : > { %v1230_v13 = vadd.f32 1.0, %v2217_v12  ;;  %v1228_v17 = vsel %vm1226_vm7, %v2217_v12, 1.0 }
 0x33a   : > { %2220 = vrcp.f32 %v1230_v13 }
 0x343   : > { %v2219_v14 = vpop.eup %2218 }
 0x344   : > { %v1233_v18 = vmul.f32 %v2219_v14, %v1227_v16  ;;  %v2211_v14 = vld [vmem:[%s2868_s25 + $0x10] sm:$0xff]   ;;  %v2213_v16 = vld [vmem:[%s2868_s25] sm:$0xff]  }
 0x347   : > { %v2221_v15 = vpop.eup %2220 }
 0x348   : > { %v1234_v19 = vmul.f32 %v2221_v15, %v1228_v17  ;;  %v2212_v15 = vld [vmem:[%s2868_s25 + $0x8] sm:$0xff]   ;;  %v1950_v17 = vld [vmem:[%s778_s27] ss:$0 sm:$0xff] }
 0x34a   : > { %v1235_v20 = vpack.c.bf16 %v1234_v19, %v1233_v18 }
 0x34c   : > { %2023 = vmatmul.mubr.msk.bf16.vlgmr.msra.gmra.mxu1 %vm1237_vm8, %v1235_v20 }
 0x34d   : > { %2038 = vmatprep.mubr.msk.bf16.mxu1 %vm2552_vm4, %v2551_v25  ;;  %2035 = vmatpush3.bf16.msra.mxu1 %v2204_v54 }
 0x34e   : > { %2036 = vmatprep.subr.bf16.mxu1 %v2551_v25 }
 0x351   : > { %2037 = vmatpush3.bf16.msra.mxu1 %v2205_v55  ;;  %v1963_v55 = vld [vmem:[%s916_s3] ss:$0 sm:$0xff] }
 0x40c   : > { %v1279_v23 = vpop.f32.mrf.mxu1 }
 0x40d   : > { %v1288_v27 = vmul.f32 %v1286_v60, %v1279_v23  ;;  %v2210_v60 = vld [vmem:[%s2868_s25 + $0x18] sm:$0xff]  }
 0x40e   : > { %v2024_v28 = vpop.f32.mrf.mxu1 }
 0x40f   : > { %v1290_v29 = vadd.f32 %v1288_v27, %v1149_v58  ;;  %v2208_v58 = vld [vmem:[%s2868_s25 + $0x28] sm:$0xff]  }
 0x410   : > { %v1282_v30 = vpop.f32.mrf.mxu1 }
 0x411   : > { %v1289_v31 = vmul.f32 %v1287_v61, %v1282_v30  ;;  %v1954_v30 = vld [vmem:[%s910_s6] ss:$0 sm:$0xff] }
 0x412   : > { %v2025_v32 = vpop.f32.mrf.mxu1 }
 0x413   : > { %v1291_v33 = vadd.f32 %v1289_v31, %v1146_v57  ;;  %v2207_v57 = vld [vmem:[%s2868_s25 + $0x30] sm:$0xff]  }
 0x415   : > { %v1292_v34 = vpack.c.bf16 %v1291_v33, %v1290_v29 }
 0x417   : > { %2031 = vmatmul.mubr.msk.bf16.vlgmr.msra.gmra.mxu0 %vm1064_vm3, %v1292_v34 }
 0x418   : > { %2058 = vmatprep.mubr.msk.bf16.mxu0 %vm2552_vm4, %v2551_v25  ;;  %2043 = vmatpush3.bf16.msra.mxu0 %v2206_v56 }
 0x419   : > { %2044 = vmatprep.subr.bf16.mxu0 %v2551_v25 }
 0x41c   : > { %2045 = vmatpush3.bf16.msra.mxu0 %v2207_v57  ;;  %v1964_v57 = vld [vmem:[%s919_s15] ss:$0 sm:$0xff] }
 0x41d   : > { %2046 = vmatprep.subr.bf16.mxu0 %v2551_v25 }
 0x420   : > { %2047 = vmatpush3.bf16.msra.mxu0 %v2208_v58 }
 0x421   : > { %2048 = vmatprep.subr.bf16.mxu0 %v2551_v25 }
 0x424   : > { %2049 = vmatpush3.bf16.msra.mxu0 %v2209_v59 }
 0x425   : > { %2050 = vmatprep.subr.bf16.mxu0 %v2551_v25 }
 0x428   : > { %2051 = vmatpush3.bf16.msra.mxu0 %v2210_v60 }
 0x429   : > { %2052 = vmatprep.subr.bf16.mxu0 %v2551_v25 }
 0x42c   : > { %2053 = vmatpush3.bf16.msra.mxu0 %v2211_v14 }
 0x42d   : > { %2054 = vmatprep.subr.bf16.mxu0 %v2551_v25 }
 0x430   : > { %2055 = vmatpush3.bf16.msra.mxu0 %v2212_v15 }
 0x431   : > { %2056 = vmatprep.subr.bf16.mxu0 %v2551_v25 }
 0x434   : > { %2057 = vmatpush3.bf16.msra.mxu0 %v2213_v16 }
 0x4d7   : > { %v1353_v36 = vpop.f32.mrf.mxu0 }
 0x4d8   : > { %v1354_v37 = vadd.f32 %v1944_v35, %v1353_v36 }
 0x4d9   : > { %v2032_v38 = vpop.f32.mrf.mxu0 }
 0x4da   : > { %v1360_v39 = vadd.f32 %v1354_v37, %v2900_v24 }
 0x4db   : > { %v1356_v40 = vpop.f32.mrf.mxu0 }
 0x4dc   : > { %v1357_v41 = vadd.f32 %v1944_v35, %v1356_v40  ;;  %v1364_v42 = vsel %vm1064_vm3, %v1360_v39, 0.0 }
 0x4dd   : > { %1365 = vadd.xlane.f32.xlu0 %v1364_v42  ;;  %v2033_v43 = vpop.f32.mrf.mxu0 }
 0x4de   : > { %v1361_v44 = vadd.f32 %v1357_v41, %v2903_v26 }
 0x4e0   : > { %v1367_v45 = vsel %vm1064_vm3, %v1361_v44, 0.0 }
 0x4e1   : > { %1368 = vadd.xlane.f32.xlu0 %v1367_v45 }
 0x566   : > { %v1366_v46 = vpop.xlane.xlu0 %1365 }
 0x567   : > { %v1371_v47 = vmul.f32 0.03125, %v1366_v46 }
 0x569   : > { %v1373_v48 = vsub.f32 %v1360_v39, %v1371_v47 }
 0x56a   : > { %v1369_v49 = vpop.xlane.xlu0 %1368 }
 0x56b   : > { %v1372_v24 = vmul.f32 0.03125, %v1369_v49  ;;  %v1375_v50 = vmul.f32 %v1373_v48, %v1373_v48 }
 0x56d   : > { %v1374_v51 = vsub.f32 %v1361_v44, %v1372_v24  ;;  %v1377_v52 = vsel %vm1064_vm3, %v1375_v50, 0.0 }
 0x56e   : > { %1378 = vadd.xlane.f32.xlu1 %v1377_v52 }
 0x56f   : > { %v1376_v53 = vmul.f32 %v1374_v51, %v1374_v51 }
 0x571   : > { %v1380_v26 = vsel %vm1064_vm3, %v1376_v53, 0.0 }
 0x572   : > { %1381 = vadd.xlane.f32.xlu1 %v1380_v26 }
 0x5f7   : > { %v1379_v61 = vpop.xlane.xlu1 %1378 }
 0x5f8   : > { %v1383_v62 = vmul.f32 0.03125, %v1379_v61 }
 0x5fa   : > { %v1385_v63 = vadd.f32 1e-05, %v1383_v62 }
 0x5fb   : > { %v1382_v0 = vpop.xlane.xlu1 %1381 }
 0x5fc   : > { %2222 = vrsqrt.f32 %v1385_v63  ;;  %v1384_v1 = vmul.f32 0.03125, %v1382_v0 }
 0x5fe   : > { %v1386_v2 = vadd.f32 1e-05, %v1384_v1 }
 0x600   : > { %2224 = vrsqrt.f32 %v1386_v2 }
 0x609   : > { %v2223_v3 = vpop.eup %2222 }
 0x60a   : > { %v1389_v4 = vmul.f32 %v2223_v3, %v1373_v48 }
 0x60c   : > { %v1397_v8 = vmul.f32 %v1948_v5, %v1389_v4 }
 0x60d   : > { %v2225_v6 = vpop.eup %2224 }
 0x60e   : > { %v1390_v7 = vmul.f32 %v2225_v6, %v1374_v51  ;;  %v1405_v11 = vadd.f32 %v1949_v9, %v1397_v8 }
 0x610   : > { %v1398_v10 = vmul.f32 %v1948_v5, %v1390_v7 }
 0x612   : > { %v1406_v12 = vadd.f32 %v1949_v9, %v1398_v10 }
 0x614   : > { %v1407_v13 = vpack.c.bf16 %v1406_v12, %v1405_v11 }
 0x616   : > { %2039 = vmatmul.mubr.msk.bf16.vlgmr.msra.gmra.mxu1 %vm1064_vm3, %v1407_v13 }
 0x6d6   : > { %v1468_v18 = vpop.f32.mrf.mxu1 }
 0x6d7   : > { %v1469_v20 = vadd.f32 %v1950_v17, %v1468_v18 }
 0x6d8   : > { %v2040_v19 = vpop.f32.mrf.mxu1 }
 0x6d9   : > { %v1475_v27 = vmax.f32 %v1469_v20, 0.0 }
 0x6da   : > { %v1471_v21 = vpop.f32.mrf.mxu1 }
 0x6db   : > { %v1472_v22 = vadd.f32 %v1950_v17, %v1471_v21 }
 0x6dc   : > { %v2041_v23 = vpop.f32.mrf.mxu1 }
 0x6dd   : > { %v1476_v28 = vmax.f32 %v1472_v22, 0.0 }
 0x6df   : > { %v1477_v29 = vpack.c.bf16 %v1476_v28, %v1475_v27 }
 0x6e1   : > { %2059 = vmatmul.mubr.bf16.vlgmr.msra.gmra.mxu0 %v1477_v29 }
 0x7a1   : > { %v1583_v25 = vpop.f32.mrf.mxu0 }
 0x7a2   : > { %v1584_v31 = vadd.f32 %v1954_v30, %v1583_v25 }
 0x7a3   : > { %v2060_v32 = vpop.f32.mrf.mxu0 }
 0x7a4   : > { %v1590_v33 = vadd.f32 %v1584_v31, %v1405_v11 }
 0x7a5   : > { %v1586_v34 = vpop.f32.mrf.mxu0 }
 0x7a6   : > { %v1587_v35 = vadd.f32 %v1954_v30, %v1586_v34  ;;  %v1594_v36 = vsel %vm1064_vm3, %v1590_v33, 0.0 }
 0x7a7   : > { %1595 = vadd.xlane.f32.xlu0 %v1594_v36  ;;  %v2061_v37 = vpop.f32.mrf.mxu0 }
 0x7a8   : > { %v1591_v38 = vadd.f32 %v1587_v35, %v1406_v12 }
 0x7aa   : > { %v1597_v39 = vsel %vm1064_vm3, %v1591_v38, 0.0 }
 0x7ab   : > { %1598 = vadd.xlane.f32.xlu1 %v1597_v39 }
 0x830   : > { %v1596_v40 = vpop.xlane.xlu0 %1595 }
 0x831   : > { %v1600_v41 = vmul.f32 0.03125, %v1596_v40 }
 0x833   : > { %v1602_v42 = vsub.f32 %v1590_v33, %v1600_v41 }
 0x834   : > { %v1599_v43 = vpop.xlane.xlu1 %1598 }
 0x835   : > { %v1601_v44 = vmul.f32 0.03125, %v1599_v43  ;;  %v1604_v45 = vmul.f32 %v1602_v42, %v1602_v42 }
 0x837   : > { %v1603_v46 = vsub.f32 %v1591_v38, %v1601_v44  ;;  %v1606_v47 = vsel %vm1064_vm3, %v1604_v45, 0.0 }
 0x838   : > { %1607 = vadd.xlane.f32.xlu0 %v1606_v47 }
 0x839   : > { %v1605_v48 = vmul.f32 %v1603_v46, %v1603_v46 }
 0x83b   : > { %v1609_v49 = vsel %vm1064_vm3, %v1605_v48, 0.0 }
 0x83c   : > { %1610 = vadd.xlane.f32.xlu1 %v1609_v49 }
 0x8c1   : > { %v1608_v24 = vpop.xlane.xlu0 %1607 }
 0x8c2   : > { %v1612_v50 = vmul.f32 0.03125, %v1608_v24 }
 0x8c4   : > { %v1614_v51 = vadd.f32 1e-05, %v1612_v50 }
 0x8c5   : > { %v1611_v52 = vpop.xlane.xlu1 %1610 }
 0x8c6   : > { %2226 = vrsqrt.f32 %v1614_v51  ;;  %v1613_v53 = vmul.f32 0.03125, %v1611_v52 }
 0x8c8   : > { %v1615_v26 = vadd.f32 1e-05, %v1613_v53 }
 0x8ca   : > { %2228 = vrsqrt.f32 %v1615_v26 }
 0x8d3   : > { %v2227_v54 = vpop.eup %2226 }
 0x8d4   : > { %v1618_v56 = vmul.f32 %v2227_v54, %v1602_v42 }
 0x8d6   : > { %v1626_v58 = vmul.f32 %v1963_v55, %v1618_v56 }
 0x8d7   : > { %v2229_v59 = vpop.eup %2228 }
 0x8d8   : > { %v1634_v60 = vadd.f32 %v1964_v57, %v1626_v58  ;;  %v1619_v61 = vmul.f32 %v2229_v59, %v1603_v46 }
 0x8da   : > { %1636 = vst.msk [vmem:[#allocation2] sm:$0xff] %vm1064_vm3, %v1634_v60  ;;  %v1627_v62 = vmul.f32 %v1963_v55, %v1619_v61  ;;  %1641 = sbr.rel (%p1965_p3) target bundleno = 2274 (0x8e2), region = 136 }
 0x8dc   : > { %v1635_v63 = vadd.f32 %v1964_v57, %v1627_v62 }
 0x8de   : > { %1637 = vst.msk [vmem:[#allocation2 + $0x8] sm:$0xff] %vm1064_vm3, %v1635_v63 }
 0x8df   : > { %v1642_v0 = vpack.c.bf16 %v1634_v60, %v1634_v60  ;;  %vm1643_vm9 = vcmask 257024  }
 0x8e1   : > { %1644 = vst.msk [vmem:[#allocation15] sm:$0xf] %vm1643_vm9, %v1642_v0 }
 0x8e2 PF: > { %p2129_p2 = scmp.eq.s32.totalorder %s2683_s2, 1  ;;  %s2553_s15 = smov [#allocation15]  }
 0x8e3   : > { %s1654_s22 = sshll.u32 %s2553_s15, 4  ;;  %s1655_s22 = int_to_ptr.vmem [resolvable:$true] %s1654_s22 }
 0x8e4   : > { %s2446_s3 = scalar_lea.vmem %s1655_s22, 64  ;;  %p2453_p9 = scmp.lt.s32.totalorder %s1655_s22, %s1655_s22 }
 0x8e5   : > { %p2447_p7 = scmp.ne.s32.totalorder %s1655_s22, %s2446_s3  ;;  %p2454_p10 = scmp.lt.s32.totalorder %s2446_s3, %s2446_s3 }
 0x8e7   : > { %p2448_p1 = pnand %p2447_p7, %p2129_p2  ;;  %p2455_p11 = por %p2454_p10, %p2453_p9 }
 0x8e9   : > { %p2449_p6 = pneg %p2448_p1 }
 0x8eb   : > { %p2456_p0 = pnand %p2455_p11, %p2449_p6 }
 0x8ed   : > { %2459 = shalt.err (!%p2456_p0)
}
 0x8ee   : > { %s3121_s8 = sld [smem:[#allocation45_spill]] }
 0x8f4   : > { %2091 = dma.vmem_to_hbm [thread:$0]  (%p2129_p2), %s1655_s22, 64, %s3121_s8, [#allocation5]  }
 0x8f5   : > { %2511 = dma.done.wait (%p2129_p2), [#allocation5], 64  }
 0x8f6   : > { %2513 = vsyncadd (%p2129_p2), [#allocation5], 4294967232 }
 0x8f7 PF: > { %s3122_s4 = sld [smem:[#allocation23_spill]]  ;;  %s3127_s0 = smov %s2520_s30 }
 0x8f8   : > { %s3123_s9 = sld [smem:[#allocation21_spill]] }
 0x8f9   : > { %s3124_s20 = sld [smem:[#allocation25_spill]] }
 0x8fa   : > { %s3125_s21 = sld [smem:[#allocation22_spill]] }
 0x8fb   : > { %s3126_s1 = sld [smem:[#allocation24_spill]] }
 0x8fd   : > { %s33_s22 = sadd.s32 1, %s3122_s4  }
 0x8fe   : > { %p30_p4 = scmp.ge.s32.totalorder %s33_s22, 4   ;;  %s3128_s30 = smov %s3123_s9 }
 0x900   :  { %32 = sbr.rel (!%p30_p4) target bundleno = 27 (0x1b), region = 217 }
 0x905   :  { %1667 = vsyncpa [#allocation4], 1 }
 0x906   :  { %1669 = vsyncpa [#allocation4 + $0x1], 1 }
 0x907   :  { %1670 = vsyncpa [#allocation7], 1 }
 0x908   :  { %1671 = vsyncpa [#allocation10], 1 }
 0x909   :  { %1672 = vsyncpa [#allocation5], 1 }
 0x90a   :  { %1674 = vsyncpa [#allocation5 + $0x1], 1 }

</bundles_post_ra>
